<compile_context>
chip_gen: v7x
topology: tpu7x:2x2x1
jax: 0.10.0
libtpu: 0.0.40
codegen_flags: <defaults>
</compile_context>

<pallas_src>
import functools
import math

import jax
import jax.numpy as jnp
from jax import lax
from jax.experimental import pallas as pl
from jax.experimental.pallas import tpu as pltpu


def _vmem_config():
    """Generation-aware VMEM sizing: (scoped limit, block-selection budget) in bytes."""
    try:
        cap = pltpu.get_tpu_info().vmem_capacity_bytes
    except Exception:
        cap = 64 * 1024 * 1024  # conservative fallback (v7x-sized VMEM)
    limit = int(cap * 0.75)     # ~96 MiB on v5e/v6e (128 MiB phys), ~48 MiB on v7x (64 MiB)
    budget = int(cap * 0.40)    # ~51 MiB on v5e/v6e,               ~25 MiB on v7x
    return limit, budget


def dot_graph_kernel(x_ref, wt_ref, b_ref, adj_ref, *, matmul_dtype):
    mb, n, d = x_ref.shape

    x = x_ref[...].astype(matmul_dtype)
    wt = wt_ref[...].astype(matmul_dtype)

    # Linear (x @ W^T + b) as a batched MXU matmul with the graph dim as batch
    # (no flatten/unflatten reshape round-trip -> no materialized VMEM copies).
    nf = jnp.einsum('bnd,df->bnf', x, wt, preferred_element_type=jnp.float32)
    nf = nf + b_ref[...]                                   # (1, d) broadcasts over (mb, n, d)

    # Gram matrix Adj = nf @ nf^T per graph; NT-matmul form, no explicit transpose.
    nf_m = nf.astype(matmul_dtype)
    adj = jnp.einsum('bnd,bmd->bnm', nf_m, nf_m, preferred_element_type=jnp.float32)

    # Diagonal mask built in-kernel (VPU filler) instead of a resident (N, N) eye input.
    rows = lax.broadcasted_iota(jnp.int32, (n, n), 0)
    cols = lax.broadcasted_iota(jnp.int32, (n, n), 1)
    diag = (rows == cols)[None, :, :]                      # (1, n, n) bool

    adj = jnp.where(diag, adj - jnp.float32(1e8), adj)     # Adj - 1e8 * I
    adj = jnp.where(adj >= 0, adj, jnp.float32(0.01) * adj)  # leaky_relu (slope 0.01)

    # softmax over the last (lane) axis, all f32; EUP approx reciprocal replaces the divide.
    adj = adj - jnp.max(adj, axis=-1, keepdims=True)
    e = jnp.exp(adj)
    s = jnp.sum(e, axis=-1, keepdims=True)
    p = e * pl.reciprocal(s, approx=True)

    adj_ref[...] = jnp.where(diag, p + jnp.float32(1.0), p)  # Adj + I


def _choose_block_m(bs, n, d, budget_bytes):
    """Largest divisor of bs whose per-block VMEM footprint fits the budget, capped so
    grid_m >= 4 when bs >= 4 (>= 2 pipelined steps per TensorCore on v7x megacore)."""
    # bytes/graph: 2x x-buf + nf + 2x out-buf + ~6 (N,N) f32 softmax temps
    per_graph = 4 * (3 * n * d + 8 * n * n)
    cap = max(1, budget_bytes // per_graph)
    if bs >= 4:
        cap = min(cap, bs // 4)
    elif bs >= 2:
        cap = min(cap, bs // 2)
    bm = 1
    for div in range(1, bs + 1):
        if bs % div == 0 and div <= cap:
            bm = div
    return bm


def dot_graph_construction(node_features, w_map, b_map, *, block_m=None,
                           matmul_dtype=jnp.bfloat16):
    """Forward pass of Dot_Graph_Construction_weights.

    node_features: (bs, N, D) float32
    w_map:         (D, D)  PyTorch nn.Linear weight (out_features, in_features)
    b_map:         (D,)    PyTorch nn.Linear bias
    matmul_dtype:  dtype for MXU operands (bf16 for speed, f32 for exactness)
    returns:       (bs, N, N) float32 adjacency
    """
    bs, n, d = node_features.shape
    x = node_features.astype(jnp.float32)

    vmem_limit, vmem_budget = _vmem_config()
    if block_m is None:
        block_m = _choose_block_m(bs, n, d, vmem_budget)
    assert bs % block_m == 0, (bs, block_m)
    grid_m = bs // block_m

    wt = w_map.astype(jnp.float32).T              # (D, D): kernel computes x @ W^T
    b = b_map.astype(jnp.float32).reshape(1, d)

    flops = 2 * bs * n * d * d + 2 * bs * n * n * d + 8 * bs * n * n
    cost = pl.CostEstimate(
        flops=flops,
        transcendentals=bs * n * n + bs * n,
        bytes_accessed=4 * (bs * n * d + bs * n * n + d * d + d),
    )

    kernel = functools.partial(dot_graph_kernel, matmul_dtype=matmul_dtype)

    return pl.pallas_call(
        kernel,
        out_shape=jax.ShapeDtypeStruct((bs, n, n), jnp.float32),
        grid_spec=pltpu.PrefetchScalarGridSpec(
            num_scalar_prefetch=0,
            grid=(grid_m,),
            in_specs=[
                pl.BlockSpec((block_m, n, d), lambda m: (m, 0, 0)),   # X block
                pl.BlockSpec((d, d), lambda m: (0, 0)),               # W_map^T (resident)
                pl.BlockSpec((1, d), lambda m: (0, 0)),               # b_map   (resident)
            ],
            out_specs=pl.BlockSpec((block_m, n, n), lambda m: (m, 0, 0)),
        ),
        compiler_params=pltpu.CompilerParams(
            dimension_semantics=("parallel",),
            vmem_limit_bytes=vmem_limit,
        ),
        cost_estimate=cost,
    )(x, wt, b)


def _reference(x, w_map, b_map):
    # Pure-JAX f32 reference of the PyTorch module.
    nf = x @ w_map.T + b_map
    adj = jnp.einsum('bnd,bmd->bnm', nf, nf)
    eye = jnp.eye(x.shape[1], dtype=x.dtype)
    adj = adj - eye * 1e8
    adj = jnp.where(adj >= 0, adj, 0.01 * adj)
    adj = jax.nn.softmax(adj, axis=-1)
    return adj + eye


if __name__ == "__main__":
    # Small shapes consistent with the module; N = 128 keeps the lane axis of Adj dense.
    bs, N, D = 8, 128, 32

    key = jax.random.PRNGKey(0)
    kx, kw, kb = jax.random.split(key, 3)
    x = jax.random.normal(kx, (bs, N, D), jnp.float32)
    lim = 1.0 / math.sqrt(D)
    w_map = jax.random.uniform(kw, (D, D), jnp.float32, -lim, lim)   # nn.Linear weight (out, in)
    b_map = jax.random.uniform(kb, (D,), jnp.float32, -lim, lim)     # nn.Linear bias

    ref = _reference(x, w_map, b_map)

    # --- exact f32 MXU-operand path: tight tolerance against the f32 reference ---
    adj_f32 = jax.block_until_ready(
        dot_graph_construction(x, w_map, b_map, matmul_dtype=jnp.float32))
    assert adj_f32.shape == (bs, N, N), adj_f32.shape
    assert bool(jnp.all(jnp.isfinite(adj_f32)))
    row_sums = jnp.sum(adj_f32, axis=-1)          # softmax row (1) + identity entry (1)
    assert bool(jnp.all(jnp.abs(row_sums - 2.0) < 1e-3))
    err_f32 = float(jnp.max(jnp.abs(adj_f32 - ref)))
    assert err_f32 < 5e-3, err_f32

    # --- default bf16 MXU-operand path: bf16 operand rounding bounds the error ---
    adj_bf16 = jax.block_until_ready(
        dot_graph_construction(x, w_map, b_map, matmul_dtype=jnp.bfloat16))
    assert adj_bf16.shape == (bs, N, N), adj_bf16.shape
    assert bool(jnp.all(jnp.isfinite(adj_bf16)))
    row_sums_bf = jnp.sum(adj_bf16, axis=-1)
    assert bool(jnp.all(jnp.abs(row_sums_bf - 2.0) < 1e-3))
    err_bf16 = float(jnp.max(jnp.abs(adj_bf16 - ref)))
    assert err_bf16 < 3e-2, err_bf16

    print("KERNEL_OK")
</pallas_src>

<mosaic_0001>
module attributes {stable_mosaic.version = 11 : i64} {
  func.func @dot_graph_kernel(%arg0: i32, %arg1: memref<2x128x32xf32, #tpu.memory_space<vmem>>, %arg2: memref<32x32xf32, #tpu.memory_space<vmem>>, %arg3: memref<1x32xf32, #tpu.memory_space<vmem>>, %arg4: memref<2x128x128xf32, #tpu.memory_space<vmem>>) attributes {dimension_semantics = [#tpu.dimension_semantics<parallel>], iteration_bounds = array<i64: 4>, scalar_prefetch = 0 : i64, scratch_operands = 0 : i64, tpu.core_type = #tpu.core_type<tc>, window_params = [{transform_indices = @transform_0, window_bounds = array<i64: 2, 128, 32>}, {pipeline_mode = #tpu.pipeline_mode<synchronous>, transform_indices = @transform_1, window_bounds = array<i64: 32, 32>}, {pipeline_mode = #tpu.pipeline_mode<synchronous>, transform_indices = @transform_2, window_bounds = array<i64: 1, 32>}, {transform_indices = @transform_3, window_bounds = array<i64: 2, 128, 128>}]} {
    %c0 = arith.constant 0 : index
    %c0_0 = arith.constant 0 : index
    %c0_1 = arith.constant 0 : index
    %0 = vector.load %arg1[%c0, %c0_0, %c0_1] : memref<2x128x32xf32, #tpu.memory_space<vmem>>, vector<2x128x32xf32>
    %c0_2 = arith.constant 0 : index
    %c0_3 = arith.constant 0 : index
    %1 = vector.load %arg2[%c0_2, %c0_3] : memref<32x32xf32, #tpu.memory_space<vmem>>, vector<32x32xf32>
    "tpu.trace_start"() <{level = 10 : i32, message = "bnd,df->bnf"}> : () -> ()
    %cst = arith.constant dense<0.000000e+00> : vector<2x128x32xf32>
    %2 = tpu.matmul %0, %1, %cst {dimension_numbers = #tpu.dot_dimension_numbers<[2], [0], [0, 1], [1], [0, 0, 0, 1, 1, 1], [], []>} : vector<2x128x32xf32>, vector<32x32xf32>, vector<2x128x32xf32> -> vector<2x128x32xf32>
    "tpu.trace_stop"() : () -> ()
    %c0_4 = arith.constant 0 : index
    %c0_5 = arith.constant 0 : index
    %3 = vector.load %arg3[%c0_4, %c0_5] : memref<1x32xf32, #tpu.memory_space<vmem>>, vector<1x32xf32>
    %4 = vector.shape_cast %3 : vector<1x32xf32> to vector<1x1x32xf32>
    %5 = vector.broadcast %4 : vector<1x1x32xf32> to vector<2x128x32xf32>
    %6 = arith.addf %2, %5 : vector<2x128x32xf32>
    "tpu.trace_start"() <{level = 10 : i32, message = "bnd,bmd->bnm"}> : () -> ()
    %cst_6 = arith.constant dense<0.000000e+00> : vector<2x128x128xf32>
    %7 = tpu.matmul %6, %6, %cst_6 {dimension_numbers = #tpu.dot_dimension_numbers<[2], [2], [1], [1], [0, 0, 0, 1, 1, 1], [0], [0]>} : vector<2x128x32xf32>, vector<2x128x32xf32>, vector<2x128x128xf32> -> vector<2x128x128xf32>
    "tpu.trace_stop"() : () -> ()
    %8 = tpu.iota {dimensions = array<i32: 0>} : vector<128x128xi32>
    %9 = tpu.iota {dimensions = array<i32: 1>} : vector<128x128xi32>
    %10 = arith.cmpi eq, %8, %9 : vector<128x128xi32>
    %11 = vector.shape_cast %10 : vector<128x128xi1> to vector<1x128x128xi1>
    %cst_7 = arith.constant 1.000000e+08 : f32
    %12 = vector.broadcast %cst_7 : f32 to vector<2x128x128xf32>
    %13 = arith.subf %7, %12 : vector<2x128x128xf32>
    %14 = vector.shape_cast %11 : vector<1x128x128xi1> to vector<1x128x128xi1>
    %15 = vector.broadcast %14 : vector<1x128x128xi1> to vector<2x128x128xi1>
    %16 = arith.select %15, %13, %7 : vector<2x128x128xi1>, vector<2x128x128xf32>
    %cst_8 = arith.constant 0.000000e+00 : f32
    %17 = vector.broadcast %cst_8 : f32 to vector<2x128x128xf32>
    %18 = arith.cmpf oge, %16, %17 : vector<2x128x128xf32>
    %cst_9 = arith.constant 0.00999999977 : f32
    %19 = vector.broadcast %cst_9 : f32 to vector<2x128x128xf32>
    %20 = arith.mulf %19, %16 : vector<2x128x128xf32>
    %21 = arith.select %18, %16, %20 : vector<2x128x128xi1>, vector<2x128x128xf32>
    %cst_10 = arith.constant dense<0xFF800000> : vector<2x128xf32>
    %22 = vector.multi_reduction <maximumf>, %21, %cst_10 [2] : vector<2x128x128xf32> to vector<2x128xf32>
    %23 = vector.shape_cast %22 : vector<2x128xf32> to vector<2x128x1xf32>
    %24 = vector.broadcast %23 : vector<2x128x1xf32> to vector<2x128x128xf32>
    %25 = arith.subf %21, %24 : vector<2x128x128xf32>
    %26 = math.exp %25 : vector<2x128x128xf32>
    %cst_11 = arith.constant dense<0.000000e+00> : vector<2x128xf32>
    %27 = vector.multi_reduction <add>, %26, %cst_11 [2] : vector<2x128x128xf32> to vector<2x128xf32>
    %28 = vector.shape_cast %27 : vector<2x128xf32> to vector<2x128x1xf32>
    %29 = tpu.reciprocal %28 {approx = true} : vector<2x128x1xf32> -> vector<2x128x1xf32>
    %30 = vector.broadcast %29 : vector<2x128x1xf32> to vector<2x128x128xf32>
    %31 = arith.mulf %26, %30 : vector<2x128x128xf32>
    %cst_12 = arith.constant 1.000000e+00 : f32
    %32 = vector.broadcast %cst_12 : f32 to vector<2x128x128xf32>
    %33 = arith.addf %31, %32 : vector<2x128x128xf32>
    %34 = vector.shape_cast %11 : vector<1x128x128xi1> to vector<1x128x128xi1>
    %35 = vector.broadcast %34 : vector<1x128x128xi1> to vector<2x128x128xi1>
    %36 = arith.select %35, %33, %31 : vector<2x128x128xi1>, vector<2x128x128xf32>
    %c0_13 = arith.constant 0 : index
    %c0_14 = arith.constant 0 : index
    %c0_15 = arith.constant 0 : index
    %37 = vector.load %arg4[%c0_13, %c0_14, %c0_15] : memref<2x128x128xf32, #tpu.memory_space<vmem>>, vector<2x128x128xf32>
    tpu.vector_store %arg4[%c0_13, %c0_14, %c0_15], %36 {strides = array<i32>} : memref<2x128x128xf32, #tpu.memory_space<vmem>>, vector<2x128x128xf32>,
    return
  }
  func.func @transform_0(%arg0: i32) -> (i32, i32, i32) {
    %c0_i32 = arith.constant 0 : i32
    %c0_i32_0 = arith.constant 0 : i32
    %c0_i32_1 = arith.constant 0 : i32
    return %arg0, %c0_i32, %c0_i32_0 : i32, i32, i32
  }
  func.func @transform_1(%arg0: i32) -> (i32, i32) {
    %c0_i32 = arith.constant 0 : i32
    %c0_i32_0 = arith.constant 0 : i32
    %c0_i32_1 = arith.constant 0 : i32
    return %c0_i32, %c0_i32_0 : i32, i32
  }
  func.func @transform_2(%arg0: i32) -> (i32, i32) {
    %c0_i32 = arith.constant 0 : i32
    %c0_i32_0 = arith.constant 0 : i32
    %c0_i32_1 = arith.constant 0 : i32
    return %c0_i32, %c0_i32_0 : i32, i32
  }
  func.func @transform_3(%arg0: i32) -> (i32, i32, i32) {
    %c0_i32 = arith.constant 0 : i32
    %c0_i32_0 = arith.constant 0 : i32
    %c0_i32_1 = arith.constant 0 : i32
    return %arg0, %c0_i32, %c0_i32_0 : i32, i32, i32
  }
}

</mosaic_0001>

<bundles_post_ra>
// kernel: tpu_custom_call.1
= control target key start
LH: loop header
LB: loop body
LE: loop exit
PB: predicated region body
PF: predicated region fallthrough
CT: control target
= control target key end

     0   :  { %8 = vsyncpa [#allocation3], 0  ;;  %s3359_s0 = inlined_call_operand.vmem [shape: f32[8,128,32], index: 0, kind: input, shape index: {}]   ;;  %s3360_s1 = inlined_call_operand.vmem [shape: f32[32,32], index: 1, kind: input, shape index: {}]   ;;  %s3361_s2 = inlined_call_operand.vmem [shape: f32[1,32], index: 2, kind: input, shape index: {}]   ;;  %s3362_s3 = inlined_call_operand.hbm [shape: f32[8,128,128], index: 3, kind: output, shape index: {}]  }
   0x1   :  { %10 = vsyncpa [#allocation3 + $0x1], 0  ;;  %s2388_s12 = smov 0   ;;  %s2390_s13 = smov 0  }
   0x2   :  { %s2392_s14 = smov 0   ;;  %s2394_s15 = smov 0  }
   0x3 LB: > { %s2409_s16 = sadd.s32 4294967295, %s2363_s15   ;;  %s1614_s17 = sadd.s32 4294967294, %s2363_s15   ;;  %s2363_s15 = sphi %s2394_s15, %s3388_s15   ;;  %s2359_s14 = sphi %s2392_s14, %s3387_s14   ;;  %s2355_s13 = sphi %s2390_s13, %s3386_s13   ;;  %s2351_s12 = sphi %s2388_s12, %s3385_s12  }
   0x4   : > { %s2413_s18 = sadd.s32 1, %s2363_s15   ;;  %s91_s19 = sadd.s32 1, %s2359_s14 }
   0x5   : > { %s88_s20 = ssub.s32 %s2363_s15, %s2413_s18  ;;  %p101_p0 = scmp.ne.s32.totalorder %s2359_s14, %s2355_s13 }
   0x6   : > { %p89_p1 = scmp.eq.s32.totalorder %s88_s20, 0  ;;  %p102_p2 = scmp.eq.s32.totalorder %s2409_s16, 3 }
   0x7   : > { %p107_p3 = scmp.ne.s32.totalorder %s2355_s13, %s2351_s12  ;;  %p108_p4 = scmp.eq.s32.totalorder %s1614_s17, 3 }
   0x8   : > { %s2424_s21 = scalar_select %p89_p1, %s2359_s14, %s91_s19  }
   0x9   : > { %p2426_p5 = por %p102_p2, %p101_p0  ;;  %p2430_p6 = por %p108_p4, %p107_p3 }
   0xa   : > { %p1617_p7 = scmp.ge.s32.totalorder %s2363_s15, 1  ;;  %p142_p8 = scmp.lt.s32.totalorder %s2363_s15, 5 }
   0xc   : > { %p143_p9 = pnand %p1617_p7, %p142_p8 }
   0xd   : > { %v207_v0 = vld [vmem:[%s3360_s1] sm:$0xff] (!%p143_p9)  ;;  %v208_v1 = vld [vmem:[%s3360_s1 + $0x8] sm:$0xff] (!%p143_p9)  ;;  %v209_v2 = vld [vmem:[%s3360_s1 + $0x10] sm:$0xff] (!%p143_p9)  ;;  %s1619_s30 = sshll.u32 (!%p143_p9), %s2409_s16, 1  ;;  %vm218_vm0 = vcmask (!%p143_p9), 261120   ;;  %s164_s17 = sand.u32 (!%p143_p9), 1, %s2355_s13  }
   0xe   : > { %146 = sbr.rel (%p143_p9) target bundleno = 920 (0x398), region = 32  ;;  %v2028_v3 = vpack.c.bf16 (!%p143_p9), %v208_v1, %v207_v0  ;;  %v210_v4 = vld [vmem:[%s3360_s1 + $0x18] sm:$0xff] (!%p143_p9)  ;;  %p168_p10 = scmp.lt.s32.totalorder (!%p143_p9), %s1619_s30, 7  ;;  %v2521_v38 = vld [vmem:[%s3361_s2] ss:$0 sm:$0xff] (!%p143_p9)  ;;  %vm2529_vm1 = vmpackc.low (!%p143_p9), %vm218_vm0, %vm218_vm0 }
   0xf   : > { %v2032_v5 = vpack.c.bf16 (!%p143_p9), %v210_v4, %v209_v2  ;;  %s1618_s19 = sshll.u32 (!%p143_p9), %s164_s17, 8  ;;  %s1759_s24 = sshll.u32 (!%p143_p9), %s2409_s16, 12 }
  0x10   : > { %2029 = vmatprep.subr.bf16.mxu0 (!%p143_p9), %v2028_v3  ;;  %s3150_s20 = scalar_lea.vmem (!%p143_p9), [#allocation2], %s1618_s19  ;;  %s3304_s28 = scalar_lea.hbm (!%p143_p9), %s3362_s3, %s1759_s24 }
  0x11   : > { %2031 = vmatpush3.bf16.msra.mxu0 (!%p143_p9), %v2028_v3  ;;  %s1552_s25 = sshll.u32 (!%p143_p9), %s3150_s20, 4  ;;  %s3318_s16 = scalar_lea.sflag (!%p143_p9), [#allocation3], %s164_s17  ;;  %s3306_s25 = int_to_ptr.vmem [resolvable:$true] %s1552_s25 }
  0x12   : > { %2033 = vmatprep.subr.bf16.mxu0 (!%p143_p9), %v2032_v5  ;;  %s2301_s29 = scalar_lea.vmem (!%p143_p9), %s3306_s25, 4096 }
  0x13   : > { %p2302_p11 = scmp.ne.s32.totalorder (!%p143_p9), %s3306_s25, %s2301_s29 }
  0x15   : > { %s3390_s30 = smov (!%p168_p10, %s1619_s30), 7  ;;  %2035 = vmatpush3.bf16.msra.mxu0 %v2032_v5  ;;  %p2303_p12 = pnand %p2302_p11, %p2426_p5 }
  0x16   : > { %s1757_s6 = sshll.u32 %s3390_s30, 7  ;;  %s2365_s30 = smov [#allocation2]  }
  0x17   : > { %s2452_s9 = scalar_lea.vmem %s3359_s0, %s1757_s6  ;;  %p2304_p13 = pneg %p2303_p12 }
  0x18   : > { %v175_v6 = vld [vmem:[%s2452_s9] sm:$0xff]  ;;  %v176_v7 = vld [vmem:[%s2452_s9 + $0x8] sm:$0xff]  ;;  %v177_v8 = vld [vmem:[%s2452_s9 + $0x10] sm:$0xff]  ;;  %s2305_s4 = sshll.u32 %s2365_s30, 4  ;;  %s2306_s4 = int_to_ptr.vmem [resolvable:$false] %s2305_s4 }
  0x19   : > { %1868 = vmatprep.mubr.msk.f32.mxu0 %vm218_vm0, %v175_v6  ;;  %v178_v9 = vld [vmem:[%s2452_s9 + $0x18] sm:$0xff]  ;;  %v179_v10 = vld [vmem:[%s2452_s9 + $0x20] sm:$0xff]  ;;  %v180_v11 = vld [vmem:[%s2452_s9 + $0x28] sm:$0xff]  ;;  %s2307_s5 = scalar_lea.vmem %s2306_s4, 8192  ;;  %p2308_p0 = scmp.lt.s32.totalorder %s3306_s25, %s2306_s4 }
  0x1a   : > { %1869 = vmatmul.mubr.msk.f32.vlgmr.msra.gmra.mrb[0].mxu0 %vm218_vm0, %v176_v7  ;;  %v181_v12 = vld [vmem:[%s2452_s9 + $0x30] sm:$0xff]  ;;  %v182_v13 = vld [vmem:[%s2452_s9 + $0x38] sm:$0xff]  ;;  %v183_v14 = vld [vmem:[%s2452_s9 + $0x40] sm:$0xff]  ;;  %p2309_p1 = scmp.lt.s32.totalorder %s2307_s5, %s2301_s29 }
  0x1b   : > { %1871 = vmatprep.mubr.msk.f32.mxu0 %vm218_vm0, %v177_v8  ;;  %v184_v15 = vld [vmem:[%s2452_s9 + $0x48] sm:$0xff]  ;;  %v185_v16 = vld [vmem:[%s2452_s9 + $0x50] sm:$0xff]  ;;  %v186_v17 = vld [vmem:[%s2452_s9 + $0x58] sm:$0xff] }
  0x1c   : > { %v187_v18 = vld [vmem:[%s2452_s9 + $0x60] sm:$0xff]  ;;  %v188_v19 = vld [vmem:[%s2452_s9 + $0x68] sm:$0xff]  ;;  %v189_v20 = vld [vmem:[%s2452_s9 + $0x70] sm:$0xff]  ;;  %p2310_p2 = por %p2309_p1, %p2308_p0 }
  0x1d   : > { %v190_v21 = vld [vmem:[%s2452_s9 + $0x78] sm:$0xff]  ;;  %v191_v22 = vld [vmem:[%s2452_s9 + $0x80] sm:$0xff]  ;;  %v192_v23 = vld [vmem:[%s2452_s9 + $0x88] sm:$0xff] }
  0x1e   : > { %1872 = vmatmul.mubr.msk.f32.gmra.mrb[2].mxu0 %vm218_vm0, %v178_v9  ;;  %v193_v24 = vld [vmem:[%s2452_s9 + $0x90] sm:$0xff]  ;;  %v194_v25 = vld [vmem:[%s2452_s9 + $0x98] sm:$0xff]  ;;  %v195_v26 = vld [vmem:[%s2452_s9 + $0xa0] sm:$0xff]  ;;  %p2311_p3 = pnand %p2310_p2, %p2304_p13 }
  0x1f   : > { %1874 = vmatprep.mubr.msk.f32.mxu0 %vm218_vm0, %v179_v10  ;;  %v196_v27 = vld [vmem:[%s2452_s9 + $0xa8] sm:$0xff]  ;;  %v197_v28 = vld [vmem:[%s2452_s9 + $0xb0] sm:$0xff]  ;;  %v198_v29 = vld [vmem:[%s2452_s9 + $0xb8] sm:$0xff] }
  0x20   : > { %v199_v30 = vld [vmem:[%s2452_s9 + $0xc0] sm:$0xff]  ;;  %v200_v31 = vld [vmem:[%s2452_s9 + $0xc8] sm:$0xff]  ;;  %v201_v32 = vld [vmem:[%s2452_s9 + $0xd0] sm:$0xff] }
  0x21   : > { %v202_v33 = vld [vmem:[%s2452_s9 + $0xd8] sm:$0xff]  ;;  %v203_v34 = vld [vmem:[%s2452_s9 + $0xe0] sm:$0xff]  ;;  %v204_v35 = vld [vmem:[%s2452_s9 + $0xe8] sm:$0xff] }
  0x22   : > { %1875 = vmatmul.mubr.msk.f32.gmra.mrb[4].mxu0 %vm218_vm0, %v180_v11  ;;  %v205_v36 = vld [vmem:[%s2452_s9 + $0xf0] sm:$0xff]  ;;  %v206_v37 = vld [vmem:[%s2452_s9 + $0xf8] sm:$0xff] }
  0x23   : > { %1877 = vmatprep.mubr.msk.f32.mxu0 %vm218_vm0, %v181_v12 }
  0x26   : > { %1878 = vmatmul.mubr.msk.f32.gmra.mrb[6].mxu0 %vm218_vm0, %v182_v13 }
  0x27   : > { %1880 = vmatprep.mubr.msk.f32.mxu0 %vm218_vm0, %v183_v14 }
  0x2a   : > { %1881 = vmatmul.mubr.msk.f32.gmra.mrb[8].mxu0 %vm218_vm0, %v184_v15 }
  0x2b   : > { %1883 = vmatprep.mubr.msk.f32.mxu0 %vm218_vm0, %v185_v16 }
  0x2e   : > { %1884 = vmatmul.mubr.msk.f32.gmra.mrb[10].mxu0 %vm218_vm0, %v186_v17 }
  0x2f   : > { %1886 = vmatprep.mubr.msk.f32.mxu0 %vm218_vm0, %v187_v18 }
  0x32   : > { %1887 = vmatmul.mubr.msk.f32.gmra.mrb[12].mxu0 %vm218_vm0, %v188_v19 }
  0x33   : > { %1889 = vmatprep.mubr.msk.f32.mxu0 %vm218_vm0, %v189_v20 }
  0x36   : > { %1890 = vmatmul.mubr.msk.f32.gmra.mrb[14].mxu0 %vm218_vm0, %v190_v21 }
  0x37   : > { %1892 = vmatprep.mubr.msk.f32.mxu0 %vm218_vm0, %v191_v22 }
  0x3a   : > { %1893 = vmatmul.mubr.msk.f32.gmra.mrb[16].mxu0 %vm218_vm0, %v192_v23 }
  0x3b   : > { %1895 = vmatprep.mubr.msk.f32.mxu0 %vm218_vm0, %v193_v24 }
  0x3e   : > { %1896 = vmatmul.mubr.msk.f32.gmra.mrb[18].mxu0 %vm218_vm0, %v194_v25 }
  0x3f   : > { %1898 = vmatprep.mubr.msk.f32.mxu0 %vm218_vm0, %v195_v26 }
  0x42   : > { %1899 = vmatmul.mubr.msk.f32.gmra.mrb[20].mxu0 %vm218_vm0, %v196_v27 }
  0x43   : > { %1901 = vmatprep.mubr.msk.f32.mxu0 %vm218_vm0, %v197_v28 }
  0x46   : > { %1902 = vmatmul.mubr.msk.f32.gmra.mrb[22].mxu0 %vm218_vm0, %v198_v29 }
  0x47   : > { %1904 = vmatprep.mubr.msk.f32.mxu0 %vm218_vm0, %v199_v30 }
  0x4a   : > { %1905 = vmatmul.mubr.msk.f32.gmra.mrb[24].mxu0 %vm218_vm0, %v200_v31 }
  0x4b   : > { %1907 = vmatprep.mubr.msk.f32.mxu0 %vm218_vm0, %v201_v32 }
  0x4e   : > { %1908 = vmatmul.mubr.msk.f32.gmra.mrb[26].mxu0 %vm218_vm0, %v202_v33 }
  0x4f   : > { %1910 = vmatprep.mubr.msk.f32.mxu0 %vm218_vm0, %v203_v34 }
  0x52   : > { %1911 = vmatmul.mubr.msk.f32.gmra.mrb[28].mxu0 %vm218_vm0, %v204_v35 }
  0x53   : > { %1913 = vmatprep.mubr.msk.f32.mxu0 %vm218_vm0, %v205_v36 }
  0x56   : > { %1914 = vmatmul.mubr.msk.f32.gmra.mrb[30].mxu0 %vm218_vm0, %v206_v37 }
  0xed   : > { %v1870_v39 = vpop.f32.mrb[0].mxu0 }
  0xee   : > { %v2524_v40 = vadd.f32 %v1870_v39, %v2521_v38  ;;  %v381_v41 = vpop.f32.mrb[1].mxu0 }
  0xef   : > { %v382_v42 = vadd.f32 %v2521_v38, %v381_v41 }
  0xf1   : > { %1948 = vmatprep.mubr.msk.f32.mxu1 %vm218_vm0, %v382_v42  ;;  %v1873_v44 = vpop.f32.mrb[2].mxu0  ;;  %v2036_v45 = vpack.c.bf16 %v2524_v40, %v382_v42 }
  0xf2   : > { %v2536_v46 = vadd.f32 %v1873_v44, %v2521_v38  ;;  %v391_v47 = vpop.f32.mrb[3].mxu0 }
  0xf3   : > { %v2539_v48 = vadd.f32 %v2521_v38, %v391_v47  ;;  %2038 = vmatprep.subr.msk.bf16.mxu1 %vm2529_vm1, %v2036_v45 }
  0xf4   : > { %2041 = vmatpush3.bf16.xpose.msk.msra.mxu1 %vm2529_vm1, %v2036_v45 }
  0xf5   : > { %v2042_v49 = vpack.c.bf16 %v2536_v46, %v2539_v48  ;;  %v1876_v50 = vpop.f32.mrb[4].mxu0 }
  0xf6   : > { %v2548_v51 = vadd.f32 %v1876_v50, %v2521_v38  ;;  %v401_v52 = vpop.f32.mrb[5].mxu0 }
  0xf7   : > { %v2551_v53 = vadd.f32 %v2521_v38, %v401_v52  ;;  %2044 = vmatprep.subr.msk.bf16.mxu1 %vm2529_vm1, %v2042_v49 }
  0xf9   : > { %v2048_v54 = vpack.c.bf16 %v2548_v51, %v2551_v53  ;;  %v1879_v55 = vpop.f32.mrb[6].mxu0 }
  0xfa   : > { %v2558_v56 = vadd.f32 %v1879_v55, %v2521_v38  ;;  %v411_v57 = vpop.f32.mrb[7].mxu0 }
  0xfb   : > { %v2561_v58 = vadd.f32 %v2521_v38, %v411_v57 }
  0xfc   : > { %2047 = vmatpush3.bf16.xpose.msk.msra.mxu1 %vm2529_vm1, %v2042_v49 }
  0xfd   : > { %v2054_v59 = vpack.c.bf16 %v2558_v56, %v2561_v58  ;;  %2050 = vmatprep.subr.msk.bf16.mxu1 %vm2529_vm1, %v2048_v54  ;;  %v1882_v60 = vpop.f32.mrb[8].mxu0 }
  0xfe   : > { %v2570_v61 = vadd.f32 %v1882_v60, %v2521_v38  ;;  %v421_v62 = vpop.f32.mrb[9].mxu0 }
  0xff   : > { %v2573_v63 = vadd.f32 %v2521_v38, %v421_v62 }
 0x101   : > { %v2060_v0 = vpack.c.bf16 %v2570_v61, %v2573_v63  ;;  %v1885_v1 = vpop.f32.mrb[10].mxu0 }
 0x102   : > { %v2578_v2 = vadd.f32 %v1885_v1, %v2521_v38  ;;  %v431_v3 = vpop.f32.mrb[11].mxu0 }
 0x103   : > { %v2581_v4 = vadd.f32 %v2521_v38, %v431_v3 }
 0x104   : > { %2053 = vmatpush3.bf16.xpose.msk.msra.mxu1 %vm2529_vm1, %v2048_v54 }
 0x105   : > { %v2066_v5 = vpack.c.bf16 %v2578_v2, %v2581_v4  ;;  %2056 = vmatprep.subr.msk.bf16.mxu1 %vm2529_vm1, %v2054_v59  ;;  %v1888_v6 = vpop.f32.mrb[12].mxu0 }
 0x106   : > { %v2590_v7 = vadd.f32 %v1888_v6, %v2521_v38  ;;  %v441_v8 = vpop.f32.mrb[13].mxu0 }
 0x107   : > { %v2593_v9 = vadd.f32 %v2521_v38, %v441_v8 }
 0x109   : > { %v2072_v10 = vpack.c.bf16 %v2590_v7, %v2593_v9  ;;  %v1891_v11 = vpop.f32.mrb[14].mxu0 }
 0x10a   : > { %v2598_v12 = vadd.f32 %v1891_v11, %v2521_v38  ;;  %v451_v13 = vpop.f32.mrb[15].mxu0 }
 0x10b   : > { %v2601_v14 = vadd.f32 %v2521_v38, %v451_v13 }
 0x10c   : > { %2059 = vmatpush3.bf16.xpose.msk.msra.mxu1 %vm2529_vm1, %v2054_v59 }
 0x10d   : > { %v2078_v15 = vpack.c.bf16 %v2598_v12, %v2601_v14  ;;  %v1894_v16 = vpop.f32.mrb[16].mxu0  ;;  %2062 = vmatprep.subr.msk.bf16.mxu1 %vm2529_vm1, %v2060_v0 }
 0x10e   : > { %v2610_v17 = vadd.f32 %v1894_v16, %v2521_v38  ;;  %v461_v18 = vpop.f32.mrb[17].mxu0 }
 0x10f   : > { %v462_v19 = vadd.f32 %v2521_v38, %v461_v18 }
 0x111   : > { %v2084_v20 = vpack.c.bf16 %v2610_v17, %v462_v19  ;;  %2004 = vmatprep.mubr.msk.f32.mxu0 %vm218_vm0, %v462_v19  ;;  %v1897_v21 = vpop.f32.mrb[18].mxu0 }
 0x112   : > { %v2616_v22 = vadd.f32 %v1897_v21, %v2521_v38  ;;  %v471_v23 = vpop.f32.mrb[19].mxu0 }
 0x113   : > { %2086 = vmatprep.subr.msk.bf16.mxu0 %vm2529_vm1, %v2084_v20  ;;  %v2621_v24 = vadd.f32 %v2521_v38, %v471_v23 }
 0x114   : > { %2065 = vmatpush3.bf16.xpose.msk.msra.mxu1 %vm2529_vm1, %v2060_v0  ;;  %2089 = vmatpush3.bf16.xpose.msk.msra.mxu0 %vm2529_vm1, %v2084_v20 }
 0x115   : > { %2068 = vmatprep.subr.msk.bf16.mxu1 %vm2529_vm1, %v2066_v5  ;;  %v2090_v25 = vpack.c.bf16 %v2616_v22, %v2621_v24  ;;  %v1900_v26 = vpop.f32.mrb[20].mxu0 }
 0x116   : > { %v2632_v27 = vadd.f32 %v1900_v26, %v2521_v38  ;;  %v481_v28 = vpop.f32.mrb[21].mxu0 }
 0x117   : > { %2092 = vmatprep.subr.msk.bf16.mxu0 %vm2529_vm1, %v2090_v25  ;;  %v2637_v29 = vadd.f32 %v2521_v38, %v481_v28 }
 0x119   : > { %v2096_v30 = vpack.c.bf16 %v2632_v27, %v2637_v29  ;;  %v1903_v31 = vpop.f32.mrb[22].mxu0 }
 0x11a   : > { %v2642_v32 = vadd.f32 %v1903_v31, %v2521_v38  ;;  %v491_v33 = vpop.f32.mrb[23].mxu0 }
 0x11b   : > { %v492_v34 = vadd.f32 %v2521_v38, %v491_v33 }
 0x11c   : > { %2071 = vmatpush3.bf16.xpose.msk.msra.mxu1 %vm2529_vm1, %v2066_v5  ;;  %2095 = vmatpush3.bf16.xpose.msk.msra.mxu0 %vm2529_vm1, %v2090_v25 }
 0x11d   : > { %2074 = vmatprep.subr.msk.bf16.mxu1 %vm2529_vm1, %v2072_v10  ;;  %2098 = vmatprep.subr.msk.bf16.mxu0 %vm2529_vm1, %v2096_v30  ;;  %v2102_v35 = vpack.c.bf16 %v2642_v32, %v492_v34  ;;  %v1906_v36 = vpop.f32.mrb[24].mxu0 }
 0x11e   : > { %v507_v37 = vadd.f32 %v1906_v36, %v2521_v38  ;;  %v501_v39 = vpop.f32.mrb[25].mxu0 }
 0x11f   : > { %v502_v41 = vadd.f32 %v2521_v38, %v501_v39 }
 0x121   : > { %v2108_v42 = vpack.c.bf16 %v507_v37, %v502_v41  ;;  %v1909_v44 = vpop.f32.mrb[26].mxu0 }
 0x122   : > { %v517_v45 = vadd.f32 %v1909_v44, %v2521_v38  ;;  %v511_v47 = vpop.f32.mrb[27].mxu0 }
 0x123   : > { %v512_v49 = vadd.f32 %v2521_v38, %v511_v47 }
 0x124   : > { %2077 = vmatpush3.bf16.xpose.msk.msra.mxu1 %vm2529_vm1, %v2072_v10  ;;  %2101 = vmatpush3.bf16.xpose.msk.msra.mxu0 %vm2529_vm1, %v2096_v30 }
 0x125   : > { %2080 = vmatprep.subr.msk.bf16.mxu1 %vm2529_vm1, %v2078_v15  ;;  %2104 = vmatprep.subr.msk.bf16.mxu0 %vm2529_vm1, %v2102_v35  ;;  %v2114_v50 = vpack.c.bf16 %v517_v45, %v512_v49  ;;  %v1912_v52 = vpop.f32.mrb[28].mxu0 }
 0x126   : > { %v527_v54 = vadd.f32 %v1912_v52, %v2521_v38  ;;  %v521_v55 = vpop.f32.mrb[29].mxu0 }
 0x127   : > { %v522_v57 = vadd.f32 %v2521_v38, %v521_v55 }
 0x129   : > { %v2120_v59 = vpack.c.bf16 %v527_v54, %v522_v57  ;;  %v1915_v60 = vpop.f32.mrb[30].mxu0 }
 0x12a   : > { %v537_v62 = vadd.f32 %v1915_v60, %v2521_v38  ;;  %v531_v0 = vpop.f32.mrb[31].mxu0 }
 0x12b   : > { %v532_v1 = vadd.f32 %v2521_v38, %v531_v0  ;;  %v926_v38 = vlaneseq }
 0x12c   : > { %2083 = vmatpush3.bf16.xpose.msk.msra.mxu1 %vm2529_vm1, %v2078_v15  ;;  %2107 = vmatpush3.bf16.xpose.msk.msra.mxu0 %vm2529_vm1, %v2102_v35 }
 0x12d   : > { %2110 = vmatprep.subr.msk.bf16.mxu0 %vm2529_vm1, %v2108_v42  ;;  %v2126_v3 = vpack.c.bf16 %v537_v62, %v532_v1 }
 0x133   : > { %1949 = vmatmul.mubr.msk.f32.vlgmr.msra.gmra.mrb[0].mxu1 %vm218_vm0, %v2524_v40  ;;  %v2741_v40 = vshrl.u32 %v926_v38, 7 }
 0x134   : > { %1951 = vmatprep.mubr.msk.f32.mxu1 %vm218_vm0, %v2539_v48  ;;  %2113 = vmatpush3.bf16.xpose.msk.msra.mxu0 %vm2529_vm1, %v2108_v42 }
 0x135   : > { %2116 = vmatprep.subr.msk.bf16.mxu0 %vm2529_vm1, %v2114_v50  ;;  %v2744_v43 = vadd.s32 8, %v2741_v40  ;;  %v2791_v20 = vadd.s32 48, %v2741_v40  ;;  %v2808_v28 = vadd.s32 72, %v2741_v40  ;;  %v2830_v42 = vadd.s32 88, %v2741_v40 }
 0x136   : > { %v2833_v44 = vadd.s32 80, %v2741_v40  ;;  %v2855_v0 = vadd.s32 96, %v2741_v40 }
 0x137   : > { %1952 = vmatmul.mubr.msk.f32.gmra.mrb[2].mxu1 %vm218_vm0, %v2536_v46  ;;  %v2746_v46 = vand.u32 127, %v926_v38 }
 0x138   : > { %1954 = vmatprep.mubr.msk.f32.mxu1 %vm218_vm0, %v2551_v53 }
 0x139   : > { %vm946_vm2 = vcmp.eq.s32.totalorder %v2744_v43, %v2746_v46  ;;  %vm945_vm3 = vcmp.eq.s32.totalorder %v2741_v40, %v2746_v46  ;;  %vm951_vm13 = vcmp.eq.s32.totalorder %v2791_v20, %v2746_v46 }
 0x13b   : > { %1955 = vmatmul.mubr.msk.f32.gmra.mrb[4].mxu1 %vm218_vm0, %v2548_v51  ;;  %v2751_v51 = vadd.s32 24, %v2741_v40 }
 0x13c   : > { %1957 = vmatprep.mubr.msk.f32.mxu1 %vm218_vm0, %v2561_v58  ;;  %2119 = vmatpush3.bf16.xpose.msk.msra.mxu0 %vm2529_vm1, %v2114_v50  ;;  %v2756_v58 = vadd.s32 16, %v2741_v40 }
 0x13d   : > { %2122 = vmatprep.subr.msk.bf16.mxu0 %vm2529_vm1, %v2120_v59  ;;  %vm948_vm4 = vcmp.eq.s32.totalorder %v2751_v51, %v2746_v46 }
 0x13e   : > { %vm947_vm6 = vcmp.eq.s32.totalorder %v2756_v58, %v2746_v46 }
 0x13f   : > { %1958 = vmatmul.mubr.msk.f32.gmra.mrb[6].mxu1 %vm218_vm0, %v2558_v56 }
 0x140   : > { %1960 = vmatprep.mubr.msk.f32.mxu1 %vm218_vm0, %v2573_v63 }
 0x143   : > { %1961 = vmatmul.mubr.msk.f32.gmra.mrb[8].mxu1 %vm218_vm0, %v2570_v61 }
 0x144   : > { %1963 = vmatprep.mubr.msk.f32.mxu1 %vm218_vm0, %v2581_v4  ;;  %2125 = vmatpush3.bf16.xpose.msk.msra.mxu0 %vm2529_vm1, %v2120_v59 }
 0x145   : > { %2128 = vmatprep.subr.msk.bf16.mxu0 %vm2529_vm1, %v2126_v3 }
 0x147   : > { %1964 = vmatmul.mubr.msk.f32.gmra.mrb[10].mxu1 %vm218_vm0, %v2578_v2  ;;  %v2762_v2 = vadd.s32 40, %v2741_v40 }
 0x148   : > { %1966 = vmatprep.mubr.msk.f32.mxu1 %vm218_vm0, %v2593_v9  ;;  %v2772_v9 = vadd.s32 32, %v2741_v40 }
 0x149   : > { %vm950_vm7 = vcmp.eq.s32.totalorder %v2762_v2, %v2746_v46 }
 0x14a   : > { %vm949_vm10 = vcmp.eq.s32.totalorder %v2772_v9, %v2746_v46 }
 0x14b   : > { %1967 = vmatmul.mubr.msk.f32.gmra.mrb[12].mxu1 %vm218_vm0, %v2590_v7 }
 0x14c   : > { %1969 = vmatprep.mubr.msk.f32.mxu1 %vm218_vm0, %v2601_v14  ;;  %2131 = vmatpush3.bf16.xpose.msk.msra.mxu0 %vm2529_vm1, %v2126_v3 }
 0x14f   : > { %1970 = vmatmul.mubr.msk.f32.gmra.mrb[14].mxu1 %vm218_vm0, %v2598_v12 }
 0x153   : > { %2005 = vmatmul.mubr.msk.f32.vlgmr.msra.gmra.mrb[32].mxu0 %vm218_vm0, %v2610_v17  ;;  %v2786_v17 = vadd.s32 56, %v2741_v40 }
 0x154   : > { %2007 = vmatprep.mubr.msk.f32.mxu0 %vm218_vm0, %v2621_v24 }
 0x155   : > { %vm952_vm12 = vcmp.eq.s32.totalorder %v2786_v17, %v2746_v46 }
 0x157   : > { %2008 = vmatmul.mubr.msk.f32.gmra.mrb[34].mxu0 %vm218_vm0, %v2616_v22 }
 0x158   : > { %2010 = vmatprep.mubr.msk.f32.mxu0 %vm218_vm0, %v2637_v29  ;;  %v2811_v29 = vadd.s32 64, %v2741_v40 }
 0x15a   : > { %vm3366_vm1 = vcmp.eq.s32.totalorder %v2811_v29, %v2746_v46 }
 0x15b   : > { %2011 = vmatmul.mubr.msk.f32.gmra.mrb[36].mxu0 %vm218_vm0, %v2632_v27 }
 0x15c   : > { %2013 = vmatprep.mubr.msk.f32.mxu0 %vm218_vm0, %v492_v34 }
 0x15f   : > { %2014 = vmatmul.mubr.msk.f32.gmra.mrb[38].mxu0 %vm218_vm0, %v2642_v32 }
 0x160   : > { %2016 = vmatprep.mubr.msk.f32.mxu0 %vm218_vm0, %v502_v41 }
 0x163   : > { %2017 = vmatmul.mubr.msk.f32.gmra.mrb[40].mxu0 %vm218_vm0, %v507_v37 }
 0x164   : > { %2019 = vmatprep.mubr.msk.f32.mxu0 %vm218_vm0, %v512_v49 }
 0x167   : > { %2020 = vmatmul.mubr.msk.f32.gmra.mrb[42].mxu0 %vm218_vm0, %v517_v45 }
 0x168   : > { %2022 = vmatprep.mubr.msk.f32.mxu0 %vm218_vm0, %v522_v57 }
 0x16b   : > { %2023 = vmatmul.mubr.msk.f32.gmra.mrb[44].mxu0 %vm218_vm0, %v527_v54 }
 0x16c   : > { %2025 = vmatprep.mubr.msk.f32.mxu0 %vm218_vm0, %v532_v1 }
 0x16f   : > { %2026 = vmatmul.mubr.msk.f32.gmra.mrb[46].mxu0 %vm218_vm0, %v537_v62  ;;  %vm3367_vm0 = vcmp.eq.s32.totalorder %v2808_v28, %v2746_v46  ;;  %v2852_v62 = vadd.s32 104, %v2741_v40 }
 0x206   : > { %v1950_v48 = vpop.f32.mrb[0].mxu1 }
 0x207   : > { %v1720_v53 = vadd.f32 -1e+08, %v1950_v48  ;;  %v654_v56 = vpop.f32.mrb[1].mxu1 }
 0x208   : > { %v1719_v61 = vadd.f32 -1e+08, %v654_v56 }
 0x209   : > { %v1026_v63 = vsel %vm946_vm2, %v1720_v53, %v1950_v48 }
 0x20a   : > { %v1090_v4 = vmul.f32 0.01, %v1026_v63  ;;  %v1025_v5 = vsel %vm945_vm3, %v1719_v61, %v654_v56  ;;  %v1953_v6 = vpop.f32.mrb[2].mxu1  ;;  %vm1058_vm5 = vcmp.ge.f32.partialorder %v1026_v63, 0.0 }
 0x20b   : > { %v1722_v7 = vadd.f32 -1e+08, %v1953_v6  ;;  %v664_v8 = vpop.f32.mrb[3].mxu1  ;;  %v1089_v10 = vmul.f32 0.01, %v1025_v5  ;;  %vm1057_vm8 = vcmp.ge.f32.partialorder %v1025_v5, 0.0 }
 0x20c   : > { %v1721_v11 = vadd.f32 -1e+08, %v664_v8  ;;  %v2774_v12 = vsel %vm1058_vm5, %v1026_v63, %v1090_v4 }
 0x20d   : > { %v1028_v13 = vsel %vm948_vm4, %v1722_v7, %v1953_v6  ;;  %1155 = vmax.xlane.f32.xlu0 %v2774_v12  ;;  %v2793_v23 = vsel %vm1057_vm8, %v1025_v5, %v1089_v10  ;;  %v2874_v6 = vadd.s32 120, %v2741_v40  ;;  %v2877_v7 = vadd.s32 112, %v2741_v40 }
 0x20e   : > { %v1092_v14 = vmul.f32 0.01, %v1028_v13  ;;  %v1027_v15 = vsel %vm947_vm6, %v1721_v11, %v664_v8  ;;  %v1956_v16 = vpop.f32.mrb[4].mxu1  ;;  %vm1060_vm9 = vcmp.ge.f32.partialorder %v1028_v13, 0.0 }
 0x20f   : > { %v1724_v18 = vadd.f32 -1e+08, %v1956_v16  ;;  %v674_v19 = vpop.f32.mrb[5].mxu1  ;;  %v1091_v21 = vmul.f32 0.01, %v1027_v15  ;;  %vm1059_vm11 = vcmp.ge.f32.partialorder %v1027_v15, 0.0 }
 0x210   : > { %v1723_v22 = vadd.f32 -1e+08, %v674_v19  ;;  %v2795_v24 = vsel %vm1060_vm9, %v1028_v13, %v1092_v14  ;;  %vm3365_vm9 = vcmp.eq.s32.totalorder %v2830_v42, %v2746_v46 }
 0x211   : > { %v1030_v25 = vsel %vm950_vm7, %v1724_v18, %v1956_v16  ;;  %1153 = vmax.xlane.f32.xlu0 %v2793_v23  ;;  %1159 = vmax.xlane.f32.xlu1 %v2795_v24  ;;  %v2815_v35 = vsel %vm1059_vm11, %v1027_v15, %v1091_v21  ;;  %vm3363_vm11 = vcmp.eq.s32.totalorder %v2833_v44, %v2746_v46 }
 0x212   : > { %v1029_v26 = vsel %vm949_vm10, %v1723_v22, %v674_v19  ;;  %v1959_v27 = vpop.f32.mrb[6].mxu1  ;;  %v1094_v33 = vmul.f32 0.01, %v1030_v25  ;;  %vm1062_vm15 = vcmp.ge.f32.partialorder %v1030_v25, 0.0 }
 0x213   : > { %v1093_v30 = vmul.f32 0.01, %v1029_v26  ;;  %v1726_v31 = vadd.f32 -1e+08, %v1959_v27  ;;  %v684_v32 = vpop.f32.mrb[7].mxu1  ;;  %vm1061_vm14 = vcmp.ge.f32.partialorder %v1029_v26, 0.0 }
 0x214   : > { %v1725_v34 = vadd.f32 -1e+08, %v684_v32  ;;  %v2837_v54 = vsel %vm1062_vm15, %v1030_v25, %v1094_v33 }
 0x215   : > { %v1032_v36 = vsel %vm952_vm12, %v1726_v31, %v1959_v27  ;;  %1157 = vmax.xlane.f32.xlu1 %v2815_v35  ;;  %v2821_v37 = vsel %vm1061_vm14, %v1029_v26, %v1093_v30 }
 0x216   : > { %v1031_v39 = vsel %vm951_vm13, %v1725_v34, %v684_v32  ;;  %1161 = vmax.xlane.f32.xlu0 %v2821_v37  ;;  %v1962_v41 = vpop.f32.mrb[8].mxu1  ;;  %v1096_v50 = vmul.f32 0.01, %v1032_v36  ;;  %vm1064_vm8 = vcmp.ge.f32.partialorder %v1032_v36, 0.0 }
 0x217   : > { %v1095_v45 = vmul.f32 0.01, %v1031_v39  ;;  %v1728_v47 = vadd.f32 -1e+08, %v1962_v41  ;;  %v694_v49 = vpop.f32.mrb[9].mxu1  ;;  %vm1063_vm5 = vcmp.ge.f32.partialorder %v1031_v39, 0.0 }
 0x218   : > { %v1727_v52 = vadd.f32 -1e+08, %v694_v49  ;;  %v2859_v56 = vsel %vm1064_vm8, %v1032_v36, %v1096_v50  ;;  %vm957_vm8 = vcmp.eq.s32.totalorder %v2855_v0, %v2746_v46 }
 0x219   : > { %v1034_v55 = vsel %vm3367_vm0, %v1728_v47, %v1962_v41  ;;  %1163 = vmax.xlane.f32.xlu1 %v2837_v54  ;;  %v2843_v57 = vsel %vm1063_vm5, %v1031_v39, %v1095_v45  ;;  %vm3364_vm5 = vcmp.eq.s32.totalorder %v2852_v62, %v2746_v46 }
 0x21a   : > { %v1033_v59 = vsel %vm3366_vm1, %v1727_v52, %v694_v49  ;;  %1165 = vmax.xlane.f32.xlu0 %v2843_v57  ;;  %v1965_v60 = vpop.f32.mrb[10].mxu1  ;;  %v1098_v48 = vmul.f32 0.01, %v1034_v55  ;;  %vm1066_vm15 = vcmp.ge.f32.partialorder %v1034_v55, 0.0 }
 0x21b   : > { %v1097_v1 = vmul.f32 0.01, %v1033_v59  ;;  %v1730_v3 = vadd.f32 -1e+08, %v1965_v60  ;;  %v704_v38 = vpop.f32.mrb[11].mxu1  ;;  %vm1065_vm14 = vcmp.ge.f32.partialorder %v1033_v59, 0.0 }
 0x21c   : > { %v1729_v53 = vadd.f32 -1e+08, %v704_v38  ;;  %v2881_v15 = vsel %vm1066_vm15, %v1034_v55, %v1098_v48  ;;  %vm960_vm15 = vcmp.eq.s32.totalorder %v2874_v6, %v2746_v46 }
 0x21d   : > { %v1036_v61 = vsel %vm3365_vm9, %v1730_v3, %v1965_v60  ;;  %1167 = vmax.xlane.f32.xlu1 %v2859_v56  ;;  %v2865_v63 = vsel %vm1065_vm14, %v1033_v59, %v1097_v1 }
 0x21e   : > { %v1035_v4 = vsel %vm3363_vm11, %v1729_v53, %v704_v38  ;;  %1169 = vmax.xlane.f32.xlu0 %v2865_v63  ;;  %v1968_v5 = vpop.f32.mrb[12].mxu1  ;;  %v1100_v13 = vmul.f32 0.01, %v1036_v61  ;;  %vm1068_vm11 = vcmp.ge.f32.partialorder %v1036_v61, 0.0 }
 0x21f   : > { %v1099_v8 = vmul.f32 0.01, %v1035_v4  ;;  %v1732_v10 = vadd.f32 -1e+08, %v1968_v5  ;;  %v714_v11 = vpop.f32.mrb[13].mxu1  ;;  %vm1067_vm14 = vcmp.ge.f32.partialorder %v1035_v4, 0.0 }
 0x220   : > { %v1731_v14 = vadd.f32 -1e+08, %v714_v11  ;;  %v2897_v31 = vsel %vm1068_vm11, %v1036_v61, %v1100_v13 }
 0x221   : > { %v1038_v16 = vsel %vm3364_vm5, %v1732_v10, %v1968_v5  ;;  %1171 = vmax.xlane.f32.xlu1 %v2881_v15  ;;  %v2887_v18 = vsel %vm1067_vm14, %v1035_v4, %v1099_v8  ;;  %vm959_vm5 = vcmp.eq.s32.totalorder %v2877_v7, %v2746_v46 }
 0x222   : > { %v1037_v19 = vsel %vm957_vm8, %v1731_v14, %v714_v11  ;;  %1173 = vmax.xlane.f32.xlu0 %v2887_v18  ;;  %v1971_v21 = vpop.f32.mrb[14].mxu1  ;;  %v1102_v27 = vmul.f32 0.01, %v1038_v16  ;;  %vm1070_vm14 = vcmp.ge.f32.partialorder %v1038_v16, 0.0 }
 0x223   : > { %v1101_v22 = vmul.f32 0.01, %v1037_v19  ;;  %v1734_v25 = vadd.f32 -1e+08, %v1971_v21  ;;  %v724_v26 = vpop.f32.mrb[15].mxu1  ;;  %vm1069_vm9 = vcmp.ge.f32.partialorder %v1037_v19, 0.0 }
 0x224   : > { %v1733_v30 = vadd.f32 -1e+08, %v724_v26  ;;  %v2909_v50 = vsel %vm1070_vm14, %v1038_v16, %v1102_v27 }
 0x225   : > { %v1040_v32 = vsel %vm960_vm15, %v1734_v25, %v1971_v21  ;;  %1175 = vmax.xlane.f32.xlu1 %v2897_v31  ;;  %v2903_v33 = vsel %vm1069_vm9, %v1037_v19, %v1101_v22 }
 0x226   : > { %v1039_v34 = vsel %vm959_vm5, %v1733_v30, %v724_v26  ;;  %v2006_v36 = vpop.f32.mrb[32].mxu0  ;;  %1177 = vmax.xlane.f32.xlu0 %v2903_v33  ;;  %v1104_v47 = vmul.f32 0.01, %v1040_v32  ;;  %vm1072_vm9 = vcmp.ge.f32.partialorder %v1040_v32, 0.0 }
 0x227   : > { %v1103_v39 = vmul.f32 0.01, %v1039_v34  ;;  %v1736_v41 = vadd.f32 -1e+08, %v2006_v36  ;;  %v847_v45 = vpop.f32.mrb[33].mxu0  ;;  %vm1071_vm11 = vcmp.ge.f32.partialorder %v1039_v34, 0.0 }
 0x228   : > { %v1735_v49 = vadd.f32 -1e+08, %v847_v45  ;;  %v2921_v61 = vsel %vm1072_vm9, %v1040_v32, %v1104_v47 }
 0x229   : > { %v1042_v52 = vsel %vm946_vm2, %v1736_v41, %v2006_v36  ;;  %1179 = vmax.xlane.f32.xlu1 %v2909_v50  ;;  %v2915_v55 = vsel %vm1071_vm11, %v1039_v34, %v1103_v39 }
 0x22a   : > { %v1041_v59 = vsel %vm945_vm3, %v1735_v49, %v847_v45  ;;  %v2009_v60 = vpop.f32.mrb[34].mxu0  ;;  %1181 = vmax.xlane.f32.xlu0 %v2915_v55  ;;  %v1106_v48 = vmul.f32 0.01, %v1042_v52  ;;  %vm1074_vm11 = vcmp.ge.f32.partialorder %v1042_v52, 0.0 }
 0x22b   : > { %v1105_v1 = vmul.f32 0.01, %v1041_v59  ;;  %v1738_v3 = vadd.f32 -1e+08, %v2009_v60  ;;  %v857_v38 = vpop.f32.mrb[35].mxu0  ;;  %vm1073_vm14 = vcmp.ge.f32.partialorder %v1041_v59, 0.0 }
 0x22c   : > { %v1737_v53 = vadd.f32 -1e+08, %v857_v38  ;;  %v2933_v21 = vsel %vm1074_vm11, %v1042_v52, %v1106_v48 }
 0x22d   : > { %v1044_v4 = vsel %vm948_vm4, %v1738_v3, %v2009_v60  ;;  %1183 = vmax.xlane.f32.xlu1 %v2921_v61  ;;  %v2927_v5 = vsel %vm1073_vm14, %v1041_v59, %v1105_v1 }
 0x22e   : > { %v1043_v8 = vsel %vm947_vm6, %v1737_v53, %v857_v38  ;;  %v2012_v10 = vpop.f32.mrb[36].mxu0  ;;  %1185 = vmax.xlane.f32.xlu0 %v2927_v5  ;;  %v1108_v16 = vmul.f32 0.01, %v1044_v4  ;;  %vm1076_vm14 = vcmp.ge.f32.partialorder %v1044_v4, 0.0 }
 0x22f   : > { %v1107_v11 = vmul.f32 0.01, %v1043_v8  ;;  %v1740_v13 = vadd.f32 -1e+08, %v2012_v10  ;;  %v867_v14 = vpop.f32.mrb[37].mxu0  ;;  %vm1075_vm9 = vcmp.ge.f32.partialorder %v1043_v8, 0.0 }
 0x230   : > { %v1739_v19 = vadd.f32 -1e+08, %v867_v14  ;;  %v2945_v41 = vsel %vm1076_vm14, %v1044_v4, %v1108_v16 }
 0x231   : > { %v1046_v22 = vsel %vm950_vm7, %v1740_v13, %v2012_v10  ;;  %1187 = vmax.xlane.f32.xlu1 %v2933_v21  ;;  %v2939_v25 = vsel %vm1075_vm9, %v1043_v8, %v1107_v11 }
 0x232   : > { %v1045_v26 = vsel %vm949_vm10, %v1739_v19, %v867_v14  ;;  %v2015_v27 = vpop.f32.mrb[38].mxu0  ;;  %1189 = vmax.xlane.f32.xlu0 %v2939_v25  ;;  %v1110_v36 = vmul.f32 0.01, %v1046_v22  ;;  %vm1078_vm9 = vcmp.ge.f32.partialorder %v1046_v22, 0.0 }
 0x233   : > { %v1109_v30 = vmul.f32 0.01, %v1045_v26  ;;  %v1742_v32 = vadd.f32 -1e+08, %v2015_v27  ;;  %v877_v34 = vpop.f32.mrb[39].mxu0  ;;  %vm1077_vm11 = vcmp.ge.f32.partialorder %v1045_v26, 0.0 }
 0x234   : > { %v1741_v39 = vadd.f32 -1e+08, %v877_v34  ;;  %v2957_v48 = vsel %vm1078_vm9, %v1046_v22, %v1110_v36 }
 0x235   : > { %v1048_v45 = vsel %vm952_vm12, %v1742_v32, %v2015_v27  ;;  %1191 = vmax.xlane.f32.xlu1 %v2945_v41  ;;  %v2951_v47 = vsel %vm1077_vm11, %v1045_v26, %v1109_v30 }
 0x236   : > { %v1047_v49 = vsel %vm951_vm13, %v1741_v39, %v877_v34  ;;  %v2018_v52 = vpop.f32.mrb[40].mxu0  ;;  %1193 = vmax.xlane.f32.xlu0 %v2951_v47  ;;  %v1112_v3 = vmul.f32 0.01, %v1048_v45  ;;  %vm1080_vm11 = vcmp.ge.f32.partialorder %v1048_v45, 0.0 }
 0x237   : > { %v1111_v59 = vmul.f32 0.01, %v1047_v49  ;;  %v1744_v60 = vadd.f32 -1e+08, %v2018_v52  ;;  %v887_v1 = vpop.f32.mrb[41].mxu0  ;;  %vm1079_vm14 = vcmp.ge.f32.partialorder %v1047_v49, 0.0 }
 0x238   : > { %v1743_v38 = vadd.f32 -1e+08, %v887_v1  ;;  %v2969_v22 = vsel %vm1080_vm11, %v1048_v45, %v1112_v3 }
 0x239   : > { %v1050_v53 = vsel %vm3367_vm0, %v1744_v60, %v2018_v52  ;;  %1195 = vmax.xlane.f32.xlu1 %v2957_v48  ;;  %v2963_v4 = vsel %vm1079_vm14, %v1047_v49, %v1111_v59  ;;  %vm3372_vm14 = vcmp.eq.s32.totalorder %v2830_v42, %v2746_v46  ;;  %vm3373_vm0 = vcmp.eq.s32.totalorder %v2833_v44, %v2746_v46 }
 0x23a   : > { %v1049_v8 = vsel %vm3366_vm1, %v1743_v38, %v887_v1  ;;  %v2021_v10 = vpop.f32.mrb[42].mxu0  ;;  %1197 = vmax.xlane.f32.xlu0 %v2963_v4  ;;  %v1114_v16 = vmul.f32 0.01, %v1050_v53  ;;  %vm1082_vm1 = vcmp.ge.f32.partialorder %v1050_v53, 0.0 }
 0x23b   : > { %v1113_v11 = vmul.f32 0.01, %v1049_v8  ;;  %v1746_v13 = vadd.f32 -1e+08, %v2021_v10  ;;  %v897_v14 = vpop.f32.mrb[43].mxu0  ;;  %vm1081_vm9 = vcmp.ge.f32.partialorder %v1049_v8, 0.0 }
 0x23c   : > { %v1745_v19 = vadd.f32 -1e+08, %v897_v14  ;;  %v2981_v52 = vsel %vm1082_vm1, %v1050_v53, %v1114_v16 }
 0x23d   : > { %v1052_v26 = vsel %vm3372_vm14, %v1746_v13, %v2021_v10  ;;  %1199 = vmax.xlane.f32.xlu1 %v2969_v22  ;;  %v2975_v27 = vsel %vm1081_vm9, %v1049_v8, %v1113_v11  ;;  %vm3374_vm9 = vcmp.eq.s32.totalorder %v2852_v62, %v2746_v46 }
 0x23e   : > { %v1051_v30 = vsel %vm3373_vm0, %v1745_v19, %v897_v14  ;;  %v2024_v32 = vpop.f32.mrb[44].mxu0  ;;  %1201 = vmax.xlane.f32.xlu0 %v2975_v27  ;;  %v1116_v45 = vmul.f32 0.01, %v1052_v26  ;;  %vm1084_vm0 = vcmp.ge.f32.partialorder %v1052_v26, 0.0 }
 0x23f   : > { %v1115_v34 = vmul.f32 0.01, %v1051_v30  ;;  %v1748_v36 = vadd.f32 -1e+08, %v2024_v32  ;;  %v907_v39 = vpop.f32.mrb[45].mxu0  ;;  %vm1083_vm11 = vcmp.ge.f32.partialorder %v1051_v30, 0.0 }
 0x240   : > { %v1747_v49 = vadd.f32 -1e+08, %v907_v39  ;;  %v2993_v13 = vsel %vm1084_vm0, %v1052_v26, %v1116_v45  ;;  %vm3375_vm0 = vcmp.eq.s32.totalorder %v2808_v28, %v2746_v46 }
 0x241   : > { %v1054_v59 = vsel %vm3374_vm9, %v1748_v36, %v2024_v32  ;;  %1203 = vmax.xlane.f32.xlu1 %v2981_v52  ;;  %v2987_v60 = vsel %vm1083_vm11, %v1051_v30, %v1115_v34 }
 0x242   : > { %v1053_v1 = vsel %vm957_vm8, %v1747_v49, %v907_v39  ;;  %v2027_v3 = vpop.f32.mrb[46].mxu0  ;;  %1205 = vmax.xlane.f32.xlu0 %v2987_v60  ;;  %v1118_v10 = vmul.f32 0.01, %v1054_v59  ;;  %vm1086_vm14 = vcmp.ge.f32.partialorder %v1054_v59, 0.0 }
 0x243   : > { %v1117_v38 = vmul.f32 0.01, %v1053_v1  ;;  %v1750_v8 = vadd.f32 -1e+08, %v2027_v3  ;;  %v917_v53 = vpop.f32.mrb[47].mxu0  ;;  %vm1085_vm1 = vcmp.ge.f32.partialorder %v1053_v1, 0.0 }
 0x244   : > { %v1749_v11 = vadd.f32 -1e+08, %v917_v53  ;;  %v3005_v26 = vsel %vm1086_vm14, %v1054_v59, %v1118_v10  ;;  %vm3377_vm14 = vcmp.eq.s32.totalorder %v2830_v42, %v2746_v46 }
 0x245   : > { %v1056_v14 = vsel %vm960_vm15, %v1750_v8, %v2027_v3  ;;  %1207 = vmax.xlane.f32.xlu1 %v2993_v13  ;;  %v2999_v16 = vsel %vm1085_vm1, %v1053_v1, %v1117_v38  ;;  %vm3376_vm1 = vcmp.eq.s32.totalorder %v2811_v29, %v2746_v46 }
 0x246   : > { %v1055_v19 = vsel %vm959_vm5, %v1749_v11, %v917_v53  ;;  %1209 = vmax.xlane.f32.xlu0 %v2999_v16  ;;  %v1120_v32 = vmul.f32 0.01, %v1056_v14  ;;  %vm1088_vm9 = vcmp.ge.f32.partialorder %v1056_v14, 0.0 }
 0x247   : > { %v1119_v30 = vmul.f32 0.01, %v1055_v19  ;;  %vm1087_vm11 = vcmp.ge.f32.partialorder %v1055_v19, 0.0 }
 0x248   : > { %v3011_v36 = vsel %vm1088_vm9, %v1056_v14, %v1120_v32  ;;  %vm3379_vm9 = vcmp.eq.s32.totalorder %v2852_v62, %v2746_v46 }
 0x249   : > { %1211 = vmax.xlane.f32.xlu1 %v3005_v26  ;;  %v3008_v34 = vsel %vm1087_vm11, %v1055_v19, %v1119_v30  ;;  %vm3378_vm11 = vcmp.eq.s32.totalorder %v2833_v44, %v2746_v46 }
 0x24a   : > { %1213 = vmax.xlane.f32.xlu0 %v3008_v34 }
 0x24d   : > { %1215 = vmax.xlane.f32.xlu1 %v3011_v36 }
 0x29a   : > { %v1156_v39 = vpop.xlane.xlu0 %1155 }
 0x29b   : > { %v1218_v45 = vsub.f32 %v2774_v12, %v1156_v39 }
 0x29d   : > { %v1251_v49 = vmul.f32 1.442695, %v1218_v45 }
 0x29e   : > { %v1154_v1 = vpop.xlane.xlu0 %1153  ;;  %v1160_v3 = vpop.xlane.xlu1 %1159 }
 0x29f   : > { %2173 = vpow2.f32 %v1251_v49  ;;  %v1217_v59 = vsub.f32 %v2793_v23, %v1154_v1  ;;  %v1220_v38 = vsub.f32 %v2795_v24, %v1160_v3 }
 0x2a1   : > { %v1249_v8 = vmul.f32 1.442695, %v1217_v59  ;;  %v1255_v53 = vmul.f32 1.442695, %v1220_v38 }
 0x2a2   : > { %v1158_v10 = vpop.xlane.xlu1 %1157 }
 0x2a3   : > { %2175 = vpow2.f32 %v1249_v8  ;;  %v1219_v11 = vsub.f32 %v2815_v35, %v1158_v10  ;;  %v1162_v14 = vpop.xlane.xlu0 %1161 }
 0x2a4   : > { %2177 = vpow2.f32 %v1255_v53  ;;  %v1221_v19 = vsub.f32 %v2821_v37, %v1162_v14 }
 0x2a5   : > { %v1253_v30 = vmul.f32 1.442695, %v1219_v11 }
 0x2a6   : > { %v1257_v12 = vmul.f32 1.442695, %v1221_v19  ;;  %v1164_v32 = vpop.xlane.xlu1 %1163 }
 0x2a7   : > { %2179 = vpow2.f32 %v1253_v30  ;;  %v1222_v39 = vsub.f32 %v2837_v54, %v1164_v32  ;;  %v1166_v45 = vpop.xlane.xlu0 %1165 }
 0x2a8   : > { %v1223_v23 = vsub.f32 %v2843_v57, %v1166_v45  ;;  %2181 = vpow2.f32 %v1257_v12 }
 0x2a9   : > { %v3021_v24 = vpop.eup %2173  ;;  %v1259_v49 = vmul.f32 1.442695, %v1222_v39 }
 0x2aa   : > { %v1261_v1 = vmul.f32 1.442695, %v1223_v23  ;;  %v1168_v3 = vpop.xlane.xlu1 %1167  ;;  %1315 = vadd.xlane.f32.xlu1 %v3021_v24 }
 0x2ab   : > { %2183 = vpow2.f32 %v1259_v49  ;;  %v1224_v35 = vsub.f32 %v2859_v56, %v1168_v3  ;;  %v1170_v37 = vpop.xlane.xlu0 %1169 }
 0x2ac   : > { %v1225_v59 = vsub.f32 %v2865_v63, %v1170_v37  ;;  %2185 = vpow2.f32 %v1261_v1 }
 0x2ad   : > { %v3026_v38 = vpop.eup %2175  ;;  %v1263_v54 = vmul.f32 1.442695, %v1224_v35 }
 0x2ae   : > { %v3028_v8 = vpop.eup %2177  ;;  %v1265_v57 = vmul.f32 1.442695, %v1225_v59  ;;  %v1172_v53 = vpop.xlane.xlu1 %1171  ;;  %1313 = vadd.xlane.f32.xlu0 %v3026_v38 }
 0x2af   : > { %2187 = vpow2.f32 %v1263_v54  ;;  %v1226_v10 = vsub.f32 %v2881_v15, %v1172_v53  ;;  %1319 = vadd.xlane.f32.xlu1 %v3028_v8  ;;  %v1174_v11 = vpop.xlane.xlu0 %1173 }
 0x2b0   : > { %v1227_v56 = vsub.f32 %v2887_v18, %v1174_v11  ;;  %2189 = vpow2.f32 %v1265_v57 }
 0x2b1   : > { %v3034_v14 = vpop.eup %2179  ;;  %v1267_v63 = vmul.f32 1.442695, %v1226_v10 }
 0x2b2   : > { %v1269_v19 = vmul.f32 1.442695, %v1227_v56  ;;  %v1176_v30 = vpop.xlane.xlu1 %1175  ;;  %1317 = vadd.xlane.f32.xlu0 %v3034_v14  ;;  %v3038_v39 = vpop.eup %2181 }
 0x2b3   : > { %2191 = vpow2.f32 %v1267_v63  ;;  %v1228_v12 = vsub.f32 %v2897_v31, %v1176_v30  ;;  %v1178_v32 = vpop.xlane.xlu0 %1177 }
 0x2b4   : > { %v1229_v15 = vsub.f32 %v2903_v33, %v1178_v32  ;;  %2193 = vpow2.f32 %v1269_v19 }
 0x2b5   : > { %v3041_v45 = vpop.eup %2183  ;;  %v1271_v23 = vmul.f32 1.442695, %v1228_v12 }
 0x2b6   : > { %v1273_v18 = vmul.f32 1.442695, %v1229_v15  ;;  %v1180_v49 = vpop.xlane.xlu1 %1179  ;;  %1323 = vadd.xlane.f32.xlu1 %v3041_v45  ;;  %1321 = vadd.xlane.f32.xlu0 %v3038_v39  ;;  %v3046_v31 = vpop.eup %2185 }
 0x2b7   : > { %2195 = vpow2.f32 %v1271_v23  ;;  %v1230_v1 = vsub.f32 %v2909_v50, %v1180_v49  ;;  %v1182_v3 = vpop.xlane.xlu0 %1181 }
 0x2b8   : > { %v1231_v35 = vsub.f32 %v2915_v55, %v1182_v3  ;;  %2197 = vpow2.f32 %v1273_v18 }
 0x2b9   : > { %v3049_v37 = vpop.eup %2187  ;;  %v1275_v33 = vmul.f32 1.442695, %v1230_v1 }
 0x2ba   : > { %v1277_v59 = vmul.f32 1.442695, %v1231_v35  ;;  %1327 = vadd.xlane.f32.xlu1 %v3049_v37  ;;  %v1184_v54 = vpop.xlane.xlu1 %1183  ;;  %1325 = vadd.xlane.f32.xlu0 %v3046_v31  ;;  %v3054_v50 = vpop.eup %2189 }
 0x2bb   : > { %2199 = vpow2.f32 %v1275_v33  ;;  %v1232_v57 = vsub.f32 %v2921_v61, %v1184_v54  ;;  %v1186_v53 = vpop.xlane.xlu0 %1185 }
 0x2bc   : > { %v1233_v10 = vsub.f32 %v2927_v5, %v1186_v53  ;;  %2201 = vpow2.f32 %v1277_v59 }
 0x2bd   : > { %v3057_v11 = vpop.eup %2191  ;;  %v1279_v55 = vmul.f32 1.442695, %v1232_v57 }
 0x2be   : > { %v1281_v56 = vmul.f32 1.442695, %v1233_v10  ;;  %1331 = vadd.xlane.f32.xlu1 %v3057_v11  ;;  %v1188_v63 = vpop.xlane.xlu1 %1187  ;;  %1329 = vadd.xlane.f32.xlu0 %v3054_v50  ;;  %v3062_v61 = vpop.eup %2193 }
 0x2bf   : > { %2203 = vpow2.f32 %v1279_v55  ;;  %v1234_v19 = vsub.f32 %v2933_v21, %v1188_v63  ;;  %v1190_v30 = vpop.xlane.xlu0 %1189 }
 0x2c0   : > { %v1235_v12 = vsub.f32 %v2939_v25, %v1190_v30  ;;  %2205 = vpow2.f32 %v1281_v56 }
 0x2c1   : > { %v3065_v32 = vpop.eup %2195  ;;  %v1283_v5 = vmul.f32 1.442695, %v1234_v19 }
 0x2c2   : > { %v1285_v15 = vmul.f32 1.442695, %v1235_v12  ;;  %1335 = vadd.xlane.f32.xlu1 %v3065_v32  ;;  %v1192_v23 = vpop.xlane.xlu1 %1191  ;;  %1333 = vadd.xlane.f32.xlu0 %v3062_v61  ;;  %v3070_v21 = vpop.eup %2197 }
 0x2c3   : > { %2207 = vpow2.f32 %v1283_v5  ;;  %v1236_v18 = vsub.f32 %v2945_v41, %v1192_v23  ;;  %v1194_v49 = vpop.xlane.xlu0 %1193 }
 0x2c4   : > { %v1237_v1 = vsub.f32 %v2951_v47, %v1194_v49  ;;  %2209 = vpow2.f32 %v1285_v15 }
 0x2c5   : > { %v3073_v3 = vpop.eup %2199  ;;  %v1287_v25 = vmul.f32 1.442695, %v1236_v18 }
 0x2c6   : > { %v1289_v35 = vmul.f32 1.442695, %v1237_v1  ;;  %1339 = vadd.xlane.f32.xlu1 %v3073_v3  ;;  %v1196_v33 = vpop.xlane.xlu1 %1195  ;;  %1337 = vadd.xlane.f32.xlu0 %v3070_v21  ;;  %v3078_v41 = vpop.eup %2201 }
 0x2c7   : > { %2211 = vpow2.f32 %v1287_v25  ;;  %v1238_v59 = vsub.f32 %v2957_v48, %v1196_v33  ;;  %v1198_v54 = vpop.xlane.xlu0 %1197 }
 0x2c8   : > { %v1239_v57 = vsub.f32 %v2963_v4, %v1198_v54  ;;  %2213 = vpow2.f32 %v1289_v35 }
 0x2c9   : > { %v3081_v53 = vpop.eup %2203  ;;  %v1291_v47 = vmul.f32 1.442695, %v1238_v59 }
 0x2ca   : > { %v1293_v10 = vmul.f32 1.442695, %v1239_v57  ;;  %1343 = vadd.xlane.f32.xlu1 %v3081_v53  ;;  %v1200_v55 = vpop.xlane.xlu1 %1199  ;;  %1341 = vadd.xlane.f32.xlu0 %v3078_v41  ;;  %v3086_v48 = vpop.eup %2205 }
 0x2cb   : > { %2215 = vpow2.f32 %v1291_v47  ;;  %v1240_v56 = vsub.f32 %v2969_v22, %v1200_v55  ;;  %v1202_v63 = vpop.xlane.xlu0 %1201 }
 0x2cc   : > { %v1241_v19 = vsub.f32 %v2975_v27, %v1202_v63  ;;  %2217 = vpow2.f32 %v1293_v10 }
 0x2cd   : > { %v3089_v30 = vpop.eup %2207  ;;  %v1295_v4 = vmul.f32 1.442695, %v1240_v56 }
 0x2ce   : > { %v1297_v12 = vmul.f32 1.442695, %v1241_v19  ;;  %1347 = vadd.xlane.f32.xlu1 %v3089_v30  ;;  %v1204_v5 = vpop.xlane.xlu1 %1203  ;;  %1345 = vadd.xlane.f32.xlu0 %v3086_v48  ;;  %v3094_v22 = vpop.eup %2209 }
 0x2cf   : > { %2219 = vpow2.f32 %v1295_v4  ;;  %v1242_v15 = vsub.f32 %v2981_v52, %v1204_v5  ;;  %v1206_v23 = vpop.xlane.xlu0 %1205 }
 0x2d0   : > { %v1243_v18 = vsub.f32 %v2987_v60, %v1206_v23  ;;  %2221 = vpow2.f32 %v1297_v12 }
 0x2d1   : > { %v3097_v49 = vpop.eup %2211  ;;  %v1299_v27 = vmul.f32 1.442695, %v1242_v15 }
 0x2d2   : > { %v1301_v1 = vmul.f32 1.442695, %v1243_v18  ;;  %1351 = vadd.xlane.f32.xlu1 %v3097_v49  ;;  %v1208_v25 = vpop.xlane.xlu1 %1207  ;;  %1349 = vadd.xlane.f32.xlu0 %v3094_v22  ;;  %v3102_v52 = vpop.eup %2213 }
 0x2d3   : > { %2223 = vpow2.f32 %v1299_v27  ;;  %v1244_v35 = vsub.f32 %v2993_v13, %v1208_v25  ;;  %v1210_v33 = vpop.xlane.xlu0 %1209 }
 0x2d4   : > { %v1245_v59 = vsub.f32 %v2999_v16, %v1210_v33  ;;  %2225 = vpow2.f32 %v1301_v1 }
 0x2d5   : > { %v3105_v54 = vpop.eup %2215  ;;  %v1303_v60 = vmul.f32 1.442695, %v1244_v35 }
 0x2d6   : > { %v1305_v57 = vmul.f32 1.442695, %v1245_v59  ;;  %1355 = vadd.xlane.f32.xlu1 %v3105_v54  ;;  %v1212_v47 = vpop.xlane.xlu1 %1211  ;;  %1353 = vadd.xlane.f32.xlu0 %v3102_v52  ;;  %v3110_v13 = vpop.eup %2217 }
 0x2d7   : > { %2227 = vpow2.f32 %v1303_v60  ;;  %v1246_v10 = vsub.f32 %v3005_v26, %v1212_v47  ;;  %v1214_v55 = vpop.xlane.xlu0 %1213 }
 0x2d8   : > { %v1247_v56 = vsub.f32 %v3008_v34, %v1214_v55  ;;  %2229 = vpow2.f32 %v1305_v57 }
 0x2d9   : > { %v3113_v63 = vpop.eup %2219  ;;  %v1307_v16 = vmul.f32 1.442695, %v1246_v10 }
 0x2da   : > { %v1309_v19 = vmul.f32 1.442695, %v1247_v56  ;;  %1359 = vadd.xlane.f32.xlu1 %v3113_v63  ;;  %v1216_v4 = vpop.xlane.xlu1 %1215  ;;  %1357 = vadd.xlane.f32.xlu0 %v3110_v13  ;;  %v3118_v5 = vpop.eup %2221 }
 0x2db   : > { %2231 = vpow2.f32 %v1307_v16  ;;  %v1248_v12 = vsub.f32 %v3011_v36, %v1216_v4 }
 0x2dc   : > { %2233 = vpow2.f32 %v1309_v19 }
 0x2dd   : > { %v3120_v26 = vpop.eup %2223  ;;  %v1311_v15 = vmul.f32 1.442695, %v1248_v12 }
 0x2de   : > { %1363 = vadd.xlane.f32.xlu1 %v3120_v26  ;;  %1361 = vadd.xlane.f32.xlu0 %v3118_v5  ;;  %v3124_v34 = vpop.eup %2225 }
 0x2df   : > { %2235 = vpow2.f32 %v1311_v15 }
 0x2e1   : > { %v3126_v23 = vpop.eup %2227 }
 0x2e2   : > { %1367 = vadd.xlane.f32.xlu1 %v3126_v23  ;;  %1365 = vadd.xlane.f32.xlu0 %v3124_v34  ;;  %v3130_v36 = vpop.eup %2229 }
 0x2e5   : > { %v3132_v18 = vpop.eup %2231 }
 0x2e6   : > { %1371 = vadd.xlane.f32.xlu1 %v3132_v18  ;;  %1369 = vadd.xlane.f32.xlu0 %v3130_v36  ;;  %v3136_v27 = vpop.eup %2233 }
 0x2e9   : > { %v3138_v1 = vpop.eup %2235 }
 0x2ea   : > { %1375 = vadd.xlane.f32.xlu1 %v3138_v1  ;;  %1373 = vadd.xlane.f32.xlu0 %v3136_v27 }
 0x337   : > { %v1316_v25 = vpop.xlane.xlu1 %1315 }
 0x338   : > { %2237 = vrcp.f32 %v1316_v25 }
 0x33b   : > { %v1314_v35 = vpop.xlane.xlu0 %1313 }
 0x33c   : > { %v1320_v33 = vpop.xlane.xlu1 %1319  ;;  %2239 = vrcp.f32 %v1314_v35 }
 0x33d   : > { %2241 = vrcp.f32 %v1320_v33 }
 0x33f   : > { %v1318_v59 = vpop.xlane.xlu0 %1317 }
 0x340   : > { %2243 = vrcp.f32 %v1318_v59 }
 0x342   : > { %v2238_v60 = vpop.eup %2237 }
 0x343   : > { %v1410_v57 = vmul.f32 %v2238_v60, %v3021_v24  ;;  %v1324_v47 = vpop.xlane.xlu1 %1323  ;;  %v1322_v10 = vpop.xlane.xlu0 %1321 }
 0x344   : > { %2245 = vrcp.f32 %v1324_v47 }
 0x345   : > { %v1442_v55 = vadd.f32 1.0, %v1410_v57  ;;  %2247 = vrcp.f32 %v1322_v10 }
 0x346   : > { %v2240_v56 = vpop.eup %2239 }
 0x347   : > { %v2242_v16 = vpop.eup %2241  ;;  %v1474_v19 = vsel %vm946_vm2, %v1442_v55, %v1410_v57  ;;  %v1409_v4 = vmul.f32 %v2240_v56, %v3026_v38  ;;  %v1328_v12 = vpop.xlane.xlu1 %1327 }
 0x348   : > { %v1326_v15 = vpop.xlane.xlu0 %1325  ;;  %1506 = vst [vmem:[%s3150_s20 + $0x8] sm:$0xff] %v1474_v19  ;;  %v1412_v24 = vmul.f32 %v2242_v16, %v3028_v8  ;;  %2249 = vrcp.f32 %v1328_v12 }
 0x349   : > { %v1441_v25 = vadd.f32 1.0, %v1409_v4  ;;  %2251 = vrcp.f32 %v1326_v15 }
 0x34a   : > { %v2244_v35 = vpop.eup %2243  ;;  %v1444_v33 = vadd.f32 1.0, %v1412_v24 }
 0x34b   : > { %v1473_v59 = vsel %vm945_vm3, %v1441_v25, %v1409_v4  ;;  %v1411_v38 = vmul.f32 %v2244_v35, %v3034_v14  ;;  %v1332_v60 = vpop.xlane.xlu1 %1331 }
 0x34c   : > { %v1330_v57 = vpop.xlane.xlu0 %1329  ;;  %v1476_v47 = vsel %vm948_vm4, %v1444_v33, %v1412_v24  ;;  %1505 = vst [vmem:[%s3150_s20] sm:$0xff] %v1473_v59  ;;  %2253 = vrcp.f32 %v1332_v60 }
 0x34d   : > { %1508 = vst [vmem:[%s3150_s20 + $0x18] sm:$0xff] %v1476_v47  ;;  %v1443_v8 = vadd.f32 1.0, %v1411_v38  ;;  %2255 = vrcp.f32 %v1330_v57 }
 0x34e   : > { %v2246_v10 = vpop.eup %2245 }
 0x34f   : > { %v2248_v55 = vpop.eup %2247  ;;  %v1475_v56 = vsel %vm947_vm6, %v1443_v8, %v1411_v38  ;;  %v1414_v14 = vmul.f32 %v2246_v10, %v3041_v45  ;;  %v1336_v16 = vpop.xlane.xlu1 %1335 }
 0x350   : > { %v1334_v19 = vpop.xlane.xlu0 %1333  ;;  %1507 = vst [vmem:[%s3150_s20 + $0x10] sm:$0xff] %v1475_v56  ;;  %v1413_v4 = vmul.f32 %v2248_v55, %v3038_v39  ;;  %2257 = vrcp.f32 %v1336_v16 }
 0x351   : > { %v1446_v12 = vadd.f32 1.0, %v1414_v14  ;;  %2259 = vrcp.f32 %v1334_v19 }
 0x352   : > { %v2250_v15 = vpop.eup %2249  ;;  %v1445_v24 = vadd.f32 1.0, %v1413_v4 }
 0x353   : > { %v2252_v25 = vpop.eup %2251  ;;  %v1478_v35 = vsel %vm950_vm7, %v1446_v12, %v1414_v14  ;;  %v1416_v33 = vmul.f32 %v2250_v15, %v3049_v37  ;;  %v1340_v59 = vpop.xlane.xlu1 %1339 }
 0x354   : > { %v1338_v45 = vpop.xlane.xlu0 %1337  ;;  %1510 = vst [vmem:[%s3150_s20 + $0x28] sm:$0xff] %v1478_v35  ;;  %v1477_v39 = vsel %vm949_vm10, %v1445_v24, %v1413_v4  ;;  %v1415_v38 = vmul.f32 %v2252_v25, %v3046_v31  ;;  %2261 = vrcp.f32 %v1340_v59 }
 0x355   : > { %1509 = vst [vmem:[%s3150_s20 + $0x20] sm:$0xff] %v1477_v39  ;;  %v1448_v60 = vadd.f32 1.0, %v1416_v33  ;;  %2263 = vrcp.f32 %v1338_v45 }
 0x356   : > { %v2254_v57 = vpop.eup %2253  ;;  %v1447_v47 = vadd.f32 1.0, %v1415_v38 }
 0x357   : > { %v2256_v8 = vpop.eup %2255  ;;  %v1480_v37 = vsel %vm952_vm12, %v1448_v60, %v1416_v33  ;;  %v1418_v10 = vmul.f32 %v2254_v57, %v3057_v11  ;;  %v1344_v55 = vpop.xlane.xlu1 %1343 }
 0x358   : > { %v1342_v56 = vpop.xlane.xlu0 %1341  ;;  %1512 = vst [vmem:[%s3150_s20 + $0x38] sm:$0xff] %v1480_v37  ;;  %v1479_v31 = vsel %vm951_vm13, %v1447_v47, %v1415_v38  ;;  %v1417_v14 = vmul.f32 %v2256_v8, %v3054_v50  ;;  %2265 = vrcp.f32 %v1344_v55 }
 0x359   : > { %1511 = vst [vmem:[%s3150_s20 + $0x30] sm:$0xff] %v1479_v31  ;;  %v1450_v16 = vadd.f32 1.0, %v1418_v10  ;;  %2267 = vrcp.f32 %v1342_v56 }
 0x35a   : > { %v2258_v19 = vpop.eup %2257  ;;  %v1449_v4 = vadd.f32 1.0, %v1417_v14 }
 0x35b   : > { %v2260_v12 = vpop.eup %2259  ;;  %v1482_v11 = vsel %vm3375_vm0, %v1450_v16, %v1418_v10  ;;  %v1420_v15 = vmul.f32 %v2258_v19, %v3065_v32  ;;  %v1348_v24 = vpop.xlane.xlu1 %1347 }
 0x35c   : > { %v1346_v25 = vpop.xlane.xlu0 %1345  ;;  %1514 = vst [vmem:[%s3150_s20 + $0x48] sm:$0xff] %v1482_v11  ;;  %v1481_v50 = vsel %vm3376_vm1, %v1449_v4, %v1417_v14  ;;  %v1419_v35 = vmul.f32 %v2260_v12, %v3062_v61  ;;  %2269 = vrcp.f32 %v1348_v24 }
 0x35d   : > { %1513 = vst [vmem:[%s3150_s20 + $0x40] sm:$0xff] %v1481_v50  ;;  %v1452_v33 = vadd.f32 1.0, %v1420_v15  ;;  %2271 = vrcp.f32 %v1346_v25 }
 0x35e   : > { %v2262_v59 = vpop.eup %2261  ;;  %v1451_v45 = vadd.f32 1.0, %v1419_v35 }
 0x35f   : > { %v2264_v39 = vpop.eup %2263  ;;  %v1484_v32 = vsel %vm3377_vm14, %v1452_v33, %v1420_v15  ;;  %v1422_v38 = vmul.f32 %v2262_v59, %v3073_v3  ;;  %v1352_v60 = vpop.xlane.xlu1 %1351 }
 0x360   : > { %v1350_v57 = vpop.xlane.xlu0 %1349  ;;  %1516 = vst [vmem:[%s3150_s20 + $0x58] sm:$0xff] %v1484_v32  ;;  %v1483_v61 = vsel %vm3378_vm11, %v1451_v45, %v1419_v35  ;;  %v1421_v47 = vmul.f32 %v2264_v39, %v3070_v21  ;;  %2273 = vrcp.f32 %v1352_v60 }
 0x361   : > { %1515 = vst [vmem:[%s3150_s20 + $0x50] sm:$0xff] %v1483_v61  ;;  %v1454_v8 = vadd.f32 1.0, %v1422_v38  ;;  %2275 = vrcp.f32 %v1350_v57 }
 0x362   : > { %v2266_v37 = vpop.eup %2265  ;;  %v1453_v10 = vadd.f32 1.0, %v1421_v47 }
 0x363   : > { %v2268_v55 = vpop.eup %2267  ;;  %v1486_v3 = vsel %vm3379_vm9, %v1454_v8, %v1422_v38  ;;  %v1424_v56 = vmul.f32 %v2266_v37, %v3081_v53  ;;  %v1356_v31 = vpop.xlane.xlu1 %1355 }
 0x364   : > { %v1354_v14 = vpop.xlane.xlu0 %1353  ;;  %1518 = vst [vmem:[%s3150_s20 + $0x68] sm:$0xff] %v1486_v3  ;;  %v1485_v21 = vsel %vm957_vm8, %v1453_v10, %v1421_v47  ;;  %v1423_v16 = vmul.f32 %v2268_v55, %v3078_v41  ;;  %2277 = vrcp.f32 %v1356_v31 }
 0x365   : > { %1517 = vst [vmem:[%s3150_s20 + $0x60] sm:$0xff] %v1485_v21  ;;  %v1456_v19 = vadd.f32 1.0, %v1424_v56  ;;  %2279 = vrcp.f32 %v1354_v14 }
 0x366   : > { %v2270_v4 = vpop.eup %2269  ;;  %v1455_v12 = vadd.f32 1.0, %v1423_v16 }
 0x367   : > { %v2272_v11 = vpop.eup %2271  ;;  %v1488_v53 = vsel %vm960_vm15, %v1456_v19, %v1424_v56  ;;  %v1426_v15 = vmul.f32 %v2270_v4, %v3089_v30  ;;  %v1360_v24 = vpop.xlane.xlu1 %1359 }
 0x368   : > { %v1358_v25 = vpop.xlane.xlu0 %1357  ;;  %1520 = vst [vmem:[%s3150_s20 + $0x78] sm:$0xff] %v1488_v53  ;;  %v1487_v41 = vsel %vm959_vm5, %v1455_v12, %v1423_v16  ;;  %v1425_v50 = vmul.f32 %v2272_v11, %v3086_v48  ;;  %2281 = vrcp.f32 %v1360_v24 }
 0x369   : > { %1519 = vst [vmem:[%s3150_s20 + $0x70] sm:$0xff] %v1487_v41  ;;  %v1458_v35 = vadd.f32 1.0, %v1426_v15  ;;  %2283 = vrcp.f32 %v1358_v25 }
 0x36a   : > { %v2274_v33 = vpop.eup %2273  ;;  %v1457_v59 = vadd.f32 1.0, %v1425_v50 }
 0x36b   : > { %v2276_v45 = vpop.eup %2275  ;;  %v1490_v30 = vsel %vm946_vm2, %v1458_v35, %v1426_v15  ;;  %v1428_v39 = vmul.f32 %v2274_v33, %v3097_v49  ;;  %v1364_v32 = vpop.xlane.xlu1 %1363  ;;  %vm3380_vm2 = vmmov %vm3375_vm0 }
 0x36c   : > { %v1362_v38 = vpop.xlane.xlu0 %1361  ;;  %1522 = vst [vmem:[%s3150_s20 + $0x88] sm:$0xff] %v1490_v30  ;;  %v1489_v48 = vsel %vm945_vm3, %v1457_v59, %v1425_v50  ;;  %v1427_v60 = vmul.f32 %v2276_v45, %v3094_v22  ;;  %2285 = vrcp.f32 %v1364_v32  ;;  %vm3381_vm3 = vmmov %vm3376_vm1 }
 0x36d   : > { %1521 = vst [vmem:[%s3150_s20 + $0x80] sm:$0xff] %v1489_v48  ;;  %v1460_v57 = vadd.f32 1.0, %v1428_v39  ;;  %2287 = vrcp.f32 %v1362_v38 }
 0x36e   : > { %v2278_v61 = vpop.eup %2277  ;;  %v1459_v43 = vadd.f32 1.0, %v1427_v60 }
 0x36f   : > { %v2280_v47 = vpop.eup %2279  ;;  %v1492_v49 = vsel %vm948_vm4, %v1460_v57, %v1428_v39  ;;  %v1430_v8 = vmul.f32 %v2278_v61, %v3105_v54  ;;  %v1368_v37 = vpop.xlane.xlu1 %1367  ;;  %vm3382_vm4 = vmmov %vm3377_vm14 }
 0x370   : > { %v1366_v40 = vpop.xlane.xlu0 %1365  ;;  %1524 = vst [vmem:[%s3150_s20 + $0x98] sm:$0xff] %v1492_v49  ;;  %v1491_v22 = vsel %vm947_vm6, %v1459_v43, %v1427_v60  ;;  %v1429_v10 = vmul.f32 %v2280_v47, %v3102_v52  ;;  %2289 = vrcp.f32 %v1368_v37  ;;  %vm3383_vm6 = vmmov %vm3378_vm11 }
 0x371   : > { %1523 = vst [vmem:[%s3150_s20 + $0x90] sm:$0xff] %v1491_v22  ;;  %v1462_v55 = vadd.f32 1.0, %v1430_v8  ;;  %2291 = vrcp.f32 %v1366_v40 }
 0x372   : > { %v2282_v3 = vpop.eup %2281  ;;  %v1461_v51 = vadd.f32 1.0, %v1429_v10 }
 0x373   : > { %v2284_v56 = vpop.eup %2283  ;;  %v1494_v54 = vsel %vm950_vm7, %v1462_v55, %v1430_v8  ;;  %v1432_v31 = vmul.f32 %v2282_v3, %v3113_v63  ;;  %v1372_v14 = vpop.xlane.xlu1 %1371  ;;  %vm3384_vm7 = vmmov %vm3379_vm9 }
 0x374   : > { %v1370_v58 = vpop.xlane.xlu0 %1369  ;;  %1526 = vst [vmem:[%s3150_s20 + $0xa8] sm:$0xff] %v1494_v54  ;;  %v1493_v52 = vsel %vm949_vm10, %v1461_v51, %v1429_v10  ;;  %v1431_v21 = vmul.f32 %v2284_v56, %v3110_v13  ;;  %2293 = vrcp.f32 %v1372_v14 }
 0x375   : > { %1525 = vst [vmem:[%s3150_s20 + $0xa0] sm:$0xff] %v1493_v52  ;;  %v1464_v16 = vadd.f32 1.0, %v1432_v31  ;;  %2295 = vrcp.f32 %v1370_v58 }
 0x376   : > { %v2286_v19 = vpop.eup %2285  ;;  %v1463_v2 = vadd.f32 1.0, %v1431_v21 }
 0x377   : > { %v2288_v4 = vpop.eup %2287  ;;  %v1496_v63 = vsel %vm952_vm12, %v1464_v16, %v1432_v31  ;;  %v1434_v12 = vmul.f32 %v2286_v19, %v3120_v26  ;;  %v1376_v11 = vpop.xlane.xlu1 %1375 }
 0x378   : > { %v1374_v9 = vpop.xlane.xlu0 %1373  ;;  %1528 = vst [vmem:[%s3150_s20 + $0xb8] sm:$0xff] %v1496_v63  ;;  %v1495_v13 = vsel %vm951_vm13, %v1463_v2, %v1431_v21  ;;  %v1433_v53 = vmul.f32 %v2288_v4, %v3118_v5  ;;  %2297 = vrcp.f32 %v1376_v11 }
 0x379   : > { %1527 = vst [vmem:[%s3150_s20 + $0xb0] sm:$0xff] %v1495_v13  ;;  %v1466_v15 = vadd.f32 1.0, %v1434_v12  ;;  %2299 = vrcp.f32 %v1374_v9 }
 0x37a   : > { %v2290_v17 = vpop.eup %2289  ;;  %v1465_v24 = vadd.f32 1.0, %v1433_v53 }
 0x37b   : > { %v2292_v25 = vpop.eup %2291  ;;  %v1498_v26 = vsel %vm3380_vm2, %v1466_v15, %v1434_v12  ;;  %v1436_v41 = vmul.f32 %v2290_v17, %v3126_v23 }
 0x37c   : > { %1530 = vst [vmem:[%s3150_s20 + $0xc8] sm:$0xff] %v1498_v26  ;;  %v1497_v20 = vsel %vm3381_vm3, %v1465_v24, %v1433_v53  ;;  %v1435_v5 = vmul.f32 %v2292_v25, %v3124_v34 }
 0x37d   : > { %1529 = vst [vmem:[%s3150_s20 + $0xc0] sm:$0xff] %v1497_v20  ;;  %v1468_v50 = vadd.f32 1.0, %v1436_v41 }
 0x37e   : > { %v2294_v35 = vpop.eup %2293  ;;  %v1467_v33 = vadd.f32 1.0, %v1435_v5 }
 0x37f   : > { %v2296_v59 = vpop.eup %2295  ;;  %v1500_v28 = vsel %vm3382_vm4, %v1468_v50, %v1436_v41  ;;  %v1438_v23 = vmul.f32 %v2294_v35, %v3132_v18 }
 0x380   : > { %1532 = vst [vmem:[%s3150_s20 + $0xd8] sm:$0xff] %v1500_v28  ;;  %v1499_v29 = vsel %vm3383_vm6, %v1467_v33, %v1435_v5  ;;  %v1437_v34 = vmul.f32 %v2296_v59, %v3130_v36 }
 0x381   : > { %1531 = vst [vmem:[%s3150_s20 + $0xd0] sm:$0xff] %v1499_v29  ;;  %v1470_v45 = vadd.f32 1.0, %v1438_v23 }
 0x382   : > { %v2298_v30 = vpop.eup %2297  ;;  %v1469_v39 = vadd.f32 1.0, %v1437_v34 }
 0x383   : > { %v2300_v32 = vpop.eup %2299  ;;  %v1502_v42 = vsel %vm3384_vm7, %v1470_v45, %v1438_v23  ;;  %v1440_v18 = vmul.f32 %v2298_v30, %v3138_v1 }
 0x384   : > { %1534 = vst [vmem:[%s3150_s20 + $0xe8] sm:$0xff] %v1502_v42  ;;  %v1501_v44 = vsel %vm957_vm8, %v1469_v39, %v1437_v34  ;;  %v1439_v36 = vmul.f32 %v2300_v32, %v3136_v27 }
 0x385   : > { %1533 = vst [vmem:[%s3150_s20 + $0xe0] sm:$0xff] %v1501_v44  ;;  %v1472_v38 = vadd.f32 1.0, %v1440_v18 }
 0x386   : > { %v1471_v48 = vadd.f32 1.0, %v1439_v36 }
 0x387   : > { %v1504_v62 = vsel %vm960_vm15, %v1472_v38, %v1440_v18 }
 0x388   : > { %1536 = vst [vmem:[%s3150_s20 + $0xf8] sm:$0xff] %v1504_v62  ;;  %v1503_v0 = vsel %vm959_vm5, %v1471_v48, %v1439_v36 }
 0x389   : > { %1535 = vst [vmem:[%s3150_s20 + $0xf0] sm:$0xff] %v1503_v0 }
 0x38a   : > { %2314 = shalt.err (!%p2311_p3)
}
 0x38b   : > { %s2315_s6 = scalar_lea.hbm %s3304_s28, 4096  ;;  %s2319_s9 = scalar_lea.hbm %s3362_s3, 16384 }
 0x38c   : > { %p2316_p4 = scmp.ne.s32.totalorder %s3304_s28, %s2315_s6  ;;  %p2320_p9 = scmp.lt.u32.totalorder %s3304_s28, %s3362_s3 }
 0x38d   : > { %p2321_p10 = scmp.lt.u32.totalorder %s2319_s9, %s2315_s6  ;;  %p2323_p12 = scmp.lt.u32.totalorder %s2315_s6, %s3304_s28 }
 0x38e   : > { %p2317_p7 = pnand %p2316_p4, %p2426_p5 }
 0x38f   : > { %p2322_p11 = por %p2321_p10, %p2320_p9 }
 0x390   : > { %p2318_p8 = pneg %p2317_p7 }
 0x391   : > { %p2324_p13 = por %p2323_p12, %p2322_p11 }
 0x393   : > { %p2325_p0 = pnand %p2324_p13, %p2318_p8 }
 0x395   : > { %2328 = shalt.err (!%p2325_p0)
}
 0x396   : > { %s2366_s17 = smov 128   ;;  %s2367_s19 = smov 8  }
 0x397   : > { %2132 = dma.vmem_to_hbm [thread:$0]  (%p2426_p5), %s3306_s25, 4096, %s3304_s28, %s3318_s16, %s2366_s17, %s2366_s17, %s2367_s19  }
 0x398 PF: > { %p2138_p1 = scmp.ge.s32.totalorder %s2363_s15, 2  ;;  %s1567_s20 = sand.u32 1, %s2351_s12  }
 0x399   : > { %s1568_s24 = scalar_lea.sflag [#allocation3], %s1567_s20 }
 0x39a   : > { %p2135_p2 = pnand %p2138_p1, %p2430_p6 }
 0x39c   : > { %2346 = dma.done.wait (!%p2135_p2), %s1568_s24, 4096  }
 0x39d   : > { %2348 = vsyncadd (!%p2135_p2), %s1568_s24, 4294963200  ;;  %p13_p3 = scmp.ge.s32.totalorder %s2413_s18, 6   ;;  %s3385_s12 = smov %s2355_s13 }
 0x39e   : > { %s3386_s13 = smov %s2359_s14  ;;  %s3387_s14 = smov %s2424_s21 }
 0x39f   : > { %s3388_s15 = smov %s2413_s18  ;;  %15 = sbr.rel (!%p13_p3) target bundleno = 3 (0x3), region = 67 }
 0x3a6   :  { %1573 = vsyncpa [#allocation3], 1 }
 0x3a7   :  { %1575 = vsyncpa [#allocation3 + $0x1], 1 }

</bundles_post_ra>
